<compile_context>
chip_gen: v7x
topology: tpu7x:2x2x1
jax: 0.10.0
libtpu: 0.0.40
codegen_flags: <defaults>
</compile_context>

<pallas_src>
import functools

import jax
import jax.numpy as jnp
import numpy as np
from jax.experimental import pallas as pl
from jax.experimental.pallas import tpu as pltpu

LANE = 128             # lane width
SUB = 8                # sublanes per f32 vreg
SLAB = SUB * LANE      # 1024 elements = one dense f32 vreg
MAX_TILE = 64 * SLAB   # 65536 batch elements per grid tile (~2 MiB/tile at Mu=4)


def _bilinear_joints_kernel(param_ref, state_ref, alpha_ref, out_ref, *,
                            dt, speed_mode, taylor_order, exp_scaling, mu_num):
    """One (joint, batch-tile) grid step.

    param_ref : SMEM (J, 4*Mu+6)   folded per-joint constants
    state_ref : VMEM (2,  S, 128)  rows [pos, vel]; batch folded into (S, 128)
    alpha_ref : VMEM (Mu, S, 128)
    out_ref   : VMEM (2,  S, 128)
    """
    j = pl.program_id(0)
    base = 4 * mu_num

    # Per-joint scalars from SMEM (lane-broadcast is free on first vector use).
    e1 = [param_ref[j, m] for m in range(mu_num)]                 # K1*Ms^2
    c1 = [param_ref[j, mu_num + m] for m in range(mu_num)]        # (K0*L1 + K1*L0)*Ms
    c2 = [param_ref[j, 2 * mu_num + m] for m in range(mu_num)]    # 2*K1*L1*Ms
    d1 = [param_ref[j, 3 * mu_num + m] for m in range(mu_num)]    # K1*Ms*|Ms|
    E0 = param_ref[j, base + 0]        # sum_mu K0*Ms^2
    C0 = param_ref[j, base + 1]        # sum_mu K0*L0*Ms
    D0 = param_ref[j, base + 2]        # sum_mu K0*Ms*|Ms|
    inv_i = param_ref[j, base + 3]     # 1/I
    b_inv_i = param_ref[j, base + 4]   # B/I
    k_inv_i = param_ref[j, base + 5]   # K/I

    tile_s = state_ref.shape[1]
    n_sub = tile_s // SUB   # process in (8,128) sub-chunks -> ~15 live vregs, no spills

    for c in range(n_sub):
        rows = slice(c * SUB, (c + 1) * SUB)        # static slice -> zero-cost view
        pos = state_ref[0, rows, :]                 # (8, 128) dense slabs
        vel = state_ref[1, rows, :]
        apos = jnp.abs(pos)

        # Stiffness Ks = sum_mu (K0+K1*a)*Ms^2 and torque numerator sum_mu B_F*Ms,
        # expanded in powers of the activation (constants folded on the host).
        ks = E0
        bnum = C0 - D0 * apos
        for m in range(mu_num):
            a = jnp.clip(alpha_ref[m, rows, :], 0.0, 1.0)
            ks = ks + e1[m] * a
            bnum = bnum + (c1[m] + c2[m] * a - d1[m] * apos) * a

        a10 = -(ks * inv_i + k_inv_i)                        # -(Ks + K)/I
        a11 = -(2.0 * jnp.sqrt(ks * inv_i) + b_inv_i)        # -(2*sqrt(Ks*I) + B)/I
        bcol = bnum * (inv_i * dt)                           # (B*dt)[1, 0]

        if speed_mode:
            # Euler step: SSout = (A*dt)@SS + (B*dt)@U0 + SS,  U0 = [1, 0]
            new_pos = pos + dt * vel
            new_vel = dt * (a10 * pos + a11 * vel) + bcol + vel
        else:
            # exp(A*dt) and col-1 of Phi1(A*dt) via Taylor + scaling-and-squaring.
            h = dt * (2.0 ** (-exp_scaling))                 # scalar: x01 entry of X
            x10 = a10 * h
            x11 = a11 * h

            # Peeled m=2 term T2 = X^2/2 (x00 == 0, T1 = X):
            t00 = (0.5 * h) * x10
            t01 = (0.5 * h) * x11
            t10 = 0.5 * (x10 * x11)
            t11 = t00 + 0.5 * (x11 * x11)

            e00 = 1.0 + t00
            e01 = h + t01
            e10 = x10 + t10
            e11 = 1.0 + x11 + t11
            p01 = (0.5 * h) + t01 * (1.0 / 3.0)
            p11 = 1.0 + 0.5 * x11 + t11 * (1.0 / 3.0)

            for m in range(3, taylor_order + 1):
                inv_m = 1.0 / m
                n00 = (t01 * x10) * inv_m
                n01 = (t00 * h + t01 * x11) * inv_m
                n10 = (t11 * x10) * inv_m
                n11 = (t10 * h + t11 * x11) * inv_m
                t00, t01, t10, t11 = n00, n01, n10, n11
                e00 = e00 + t00
                e01 = e01 + t01
                e10 = e10 + t10
                e11 = e11 + t11
                cm = 1.0 / (m + 1)
                p01 = p01 + t01 * cm
                p11 = p11 + t11 * cm

            # Doubling: exp(2X) = E^2 ;  Phi1(2X) = (E + I) Phi1(X) / 2  (column 1 only).
            for _ in range(exp_scaling):
                q01 = ((e00 + 1.0) * p01 + e01 * p11) * 0.5
                q11 = (e10 * p01 + (e11 + 1.0) * p11) * 0.5
                tr = e00 + e11
                od = e01 * e10
                e00, e11, e01, e10 = e00 * e00 + od, e11 * e11 + od, e01 * tr, e10 * tr
                p01, p11 = q01, q11

            # SSout = exp(A*dt) @ SS + Phi1(A*dt) @ [0, B10*dt]^T
            new_pos = e00 * pos + e01 * vel + p01 * bcol
            new_vel = e10 * pos + e11 * vel + p11 * bcol

        out_ref[0, rows, :] = new_pos          # lane-dense unmasked stores
        out_ref[1, rows, :] = new_vel


def prepare_bilinear_params(params):
    """Fold per-muscle / per-joint constants into a tiny (J, 4*Mu+6) table.

    Depends only on the (static) module parameters — compute once per model and reuse
    for every step; it lives in SMEM during the kernel (no per-batch broadcast)."""
    K0 = jnp.asarray(params["K0s"], jnp.float32)
    K1 = jnp.asarray(params["K1s"], jnp.float32)
    L0 = jnp.asarray(params["L0s"], jnp.float32)
    L1 = jnp.asarray(params["L1s"], jnp.float32)
    Ms = jnp.asarray(params["Ms"], jnp.float32)
    joint_num = K0.shape[0]
    I = jnp.asarray(params["I"], jnp.float32).reshape(joint_num)
    B = jnp.asarray(params["B"], jnp.float32).reshape(joint_num)
    K = jnp.asarray(params["K"], jnp.float32).reshape(joint_num)

    ms2 = Ms * Ms
    ms_abs = Ms * jnp.abs(Ms)
    e1 = K1 * ms2                        # coefficient of a      in Ks
    c1 = (K0 * L1 + K1 * L0) * Ms        # coefficient of a      in B_F*Ms
    c2 = 2.0 * K1 * L1 * Ms              # coefficient of a^2    in B_F*Ms
    d1 = K1 * ms_abs                     # coefficient of a*|pos| in B_F*Ms
    inv_i = 1.0 / I
    jcols = jnp.stack([
        jnp.sum(K0 * ms2, axis=1),       # E0
        jnp.sum(K0 * L0 * Ms, axis=1),   # C0
        jnp.sum(K0 * ms_abs, axis=1),    # D0
        inv_i, B * inv_i, K * inv_i], axis=1)            # (J, 6)
    return jnp.concatenate([e1, c1, c2, d1, jcols], axis=1)   # (J, 4*Mu+6)


def bilinear_joints_forward(SS, Alphas, params, dt, speed_mode=False,
                            taylor_order=7, exp_scaling=3):
    """Pallas implementation of BilinearJoints.forward. Returns (SSout[...,0], SSout)."""
    assert taylor_order >= 2
    batch, joint_num, _ = SS.shape
    muscle_num = Alphas.shape[2]

    # Pad batch to a multiple of one dense slab (1024 = 8x128) and pick a tile size
    # that keeps double-buffered VMEM small on every generation (v7x: 64 MiB physical).
    if batch <= MAX_TILE:
        b_pad = -(-batch // SLAB) * SLAB
        tile_b = b_pad
    else:
        b_pad = -(-batch // MAX_TILE) * MAX_TILE
        tile_b = MAX_TILE
    n_tiles = b_pad // tile_b
    tile_s = tile_b // LANE
    s_total = b_pad // LANE
    pad = b_pad - batch

    # Lane-dense layout: (batch, joint, c) -> (c, joint, sublane, lane).
    # TODO(synk): adopt a (c, J, B) layout upstream to remove these transpose passes.
    state = jnp.transpose(SS.astype(jnp.float32), (2, 1, 0))           # (2, J, B)
    state = jnp.pad(state, ((0, 0), (0, 0), (0, pad)))
    state = state.reshape(2, joint_num, s_total, LANE)
    alphas = jnp.transpose(Alphas.astype(jnp.float32), (2, 1, 0))      # (Mu, J, B)
    alphas = jnp.pad(alphas, ((0, 0), (0, 0), (0, pad)))
    alphas = alphas.reshape(muscle_num, joint_num, s_total, LANE)
    packed = prepare_bilinear_params(params)                           # (J, 4*Mu+6)

    # TODO(synk): for multi-step rollouts, move the time loop inside the kernel (state
    # carried in VMEM scratch, params resident) to amortize launch + HBM round-trips.

    kernel = functools.partial(
        _bilinear_joints_kernel, dt=float(dt), speed_mode=bool(speed_mode),
        taylor_order=int(taylor_order), exp_scaling=int(exp_scaling),
        mu_num=muscle_num)

    out = pl.pallas_call(
        kernel,
        out_shape=jax.ShapeDtypeStruct((2, joint_num, s_total, LANE), jnp.float32),
        grid=(joint_num, n_tiles),
        in_specs=[
            pl.BlockSpec(memory_space=pltpu.MemorySpace.SMEM),          # tiny param table
            pl.BlockSpec((2, None, tile_s, LANE), lambda j, t: (0, j, t, 0)),
            pl.BlockSpec((muscle_num, None, tile_s, LANE), lambda j, t: (0, j, t, 0)),
        ],
        out_specs=pl.BlockSpec((2, None, tile_s, LANE), lambda j, t: (0, j, t, 0)),
        compiler_params=pltpu.CompilerParams(
            dimension_semantics=("parallel", "parallel")),
    )(packed, state, alphas)

    SSout = jnp.transpose(out.reshape(2, joint_num, b_pad)[:, :, :batch], (2, 1, 0))
    return SSout[:, :, 0], SSout


def bilinear_joints_reference(SS, Alphas, params, dt, speed_mode=False):
    """Pure-JAX line-by-line translation of the PyTorch forward (uses expm)."""
    batch, joint_num, _ = SS.shape
    K0s, K1s, L0s, L1s, Ms = (jnp.asarray(params[k], jnp.float32)[None]
                              for k in ("K0s", "K1s", "L0s", "L1s", "Ms"))
    Iv = jnp.asarray(params["I"], jnp.float32)[None]
    Bv = jnp.asarray(params["B"], jnp.float32)[None]
    Kv = jnp.asarray(params["K"], jnp.float32)[None]

    Alphas = jnp.clip(Alphas.astype(jnp.float32), 0.0, 1.0)
    SS = SS.astype(jnp.float32)
    muscle_SSs = SS[:, :, :, None] * Ms[:, :, None, :]                  # (B, J, 2, Mu)

    K = (K0s + K1s * Alphas) * Ms * Ms
    K = K.sum(axis=2)
    A10 = -(K + Kv) / Iv
    D = jnp.sqrt(K * Iv) * 2.0
    A11 = -(D + Bv) / Iv
    A00 = jnp.zeros((batch, joint_num), jnp.float32)
    A01 = jnp.ones((batch, joint_num), jnp.float32)
    A = jnp.stack([jnp.stack([A00, A01], axis=2), jnp.stack([A10, A11], axis=2)], axis=2)

    B_F = (K0s + K1s * Alphas) * (L0s + L1s * Alphas - jnp.abs(muscle_SSs[:, :, 0, :])) \
        + K1s * L1s * Alphas * Alphas
    B10 = (B_F * Ms / Iv[..., None]).sum(axis=2)
    B11 = jnp.ones((batch, joint_num), jnp.float32) / Iv
    B0 = jnp.zeros((batch, joint_num, 2), jnp.float32)
    B1 = jnp.stack([B10, B11], axis=2)
    Bm = jnp.stack([B0, B1], axis=2)

    U0 = jnp.zeros((batch, joint_num, 2), jnp.float32).at[:, :, 0].set(1.0)
    U1 = U0

    if not speed_mode:
        z22 = jnp.zeros((batch, joint_num, 2, 2), jnp.float32)
        z24 = jnp.zeros((batch, joint_num, 2, 4), jnp.float32)
        z26 = jnp.zeros((batch, joint_num, 2, 6), jnp.float32)
        eye2 = jnp.broadcast_to(jnp.eye(2, dtype=jnp.float32), (batch, joint_num, 2, 2))
        M = jnp.concatenate([
            jnp.concatenate([A * dt, Bm * dt, z22], axis=3),
            jnp.concatenate([z24, eye2], axis=3),
            z26], axis=2)
        expMT = jax.scipy.linalg.expm(M)
        Ad = expMT[:, :, :2, :2]
        Bd1 = expMT[:, :, :2, 4:]
        Bd0 = expMT[:, :, :2, 2:4] - Bd1
        SSout = (Ad @ SS[..., None] + Bd0 @ U0[..., None] + Bd1 @ U1[..., None])[..., 0]
    else:
        SSout = ((A * dt) @ SS[..., None] + (Bm * dt) @ U0[..., None] + SS[..., None])[..., 0]
    return SSout[:, :, 0], SSout


if __name__ == "__main__":
    batch, joint_num, muscle_num = 8, 2, 4
    dt = 0.0166667

    key = jax.random.PRNGKey(0)
    k = jax.random.split(key, 8)

    # Deterministic synthetic parameters (shapes from __init__: (joint, muscle) / (joint,))
    params = {
        "K0s": jax.random.uniform(k[0], (joint_num, muscle_num), jnp.float32, 5.0, 15.0),
        "K1s": jax.random.uniform(k[1], (joint_num, muscle_num), jnp.float32, 5.0, 15.0),
        "L0s": jax.random.uniform(k[2], (joint_num, muscle_num), jnp.float32, 0.05, 0.15),
        "L1s": jax.random.uniform(k[3], (joint_num, muscle_num), jnp.float32, 0.05, 0.15),
        "Ms":  jax.random.uniform(k[4], (joint_num, muscle_num), jnp.float32, -0.06, 0.06),
        "I":   jnp.full((joint_num,), 0.05, jnp.float32),   # parameters['I'] repeated per joint
        "B":   jnp.full((joint_num,), 0.5, jnp.float32),
        "K":   jnp.full((joint_num,), 0.1, jnp.float32),
    }

    SS = jnp.concatenate([
        jax.random.uniform(k[5], (batch, joint_num, 1), jnp.float32, -0.3, 0.3),   # position
        jax.random.uniform(k[6], (batch, joint_num, 1), jnp.float32, -1.0, 1.0),   # speed
    ], axis=2)
    Alphas = jax.random.uniform(k[7], (batch, joint_num, muscle_num), jnp.float32, -0.2, 1.2)

    # Exact (matrix-exponential) path
    pos_out, SSout = bilinear_joints_forward(SS, Alphas, params, dt, speed_mode=False)
    jax.block_until_ready(SSout)
    ref_pos, ref_SSout = bilinear_joints_reference(SS, Alphas, params, dt, speed_mode=False)
    np.testing.assert_allclose(np.asarray(SSout), np.asarray(ref_SSout), rtol=3e-4, atol=3e-5)
    np.testing.assert_allclose(np.asarray(pos_out), np.asarray(ref_pos), rtol=3e-4, atol=3e-5)

    # Euler (speed_mode) path
    pos_s, SS_s = bilinear_joints_forward(SS, Alphas, params, dt, speed_mode=True)
    jax.block_until_ready(SS_s)
    ref_pos_s, ref_SS_s = bilinear_joints_reference(SS, Alphas, params, dt, speed_mode=True)
    np.testing.assert_allclose(np.asarray(SS_s), np.asarray(ref_SS_s), rtol=3e-4, atol=3e-5)
    np.testing.assert_allclose(np.asarray(pos_s), np.asarray(ref_pos_s), rtol=3e-4, atol=3e-5)

    print("KERNEL_OK")
</pallas_src>

<mosaic_0001>
module attributes {stable_mosaic.version = 11 : i64} {
  func.func @_bilinear_joints_kernel(%arg0: i32, %arg1: i32, %arg2: memref<2x22xf32, #tpu.memory_space<smem>>, %arg3: memref<2x1x8x128xf32, #tpu.memory_space<vmem>>, %arg4: memref<4x1x8x128xf32, #tpu.memory_space<vmem>>, %arg5: memref<2x1x8x128xf32, #tpu.memory_space<vmem>>) attributes {dimension_semantics = [#tpu.dimension_semantics<parallel>, #tpu.dimension_semantics<parallel>], iteration_bounds = array<i64: 2, 1>, scalar_prefetch = 0 : i64, scratch_operands = 0 : i64, tpu.core_type = #tpu.core_type<tc>, window_params = [{transform_indices = @transform_0, window_bounds = array<i64: 2, 22>}, {transform_indices = @transform_1, window_bounds = array<i64: 2, 1, 8, 128>}, {transform_indices = @transform_2, window_bounds = array<i64: 4, 1, 8, 128>}, {transform_indices = @transform_3, window_bounds = array<i64: 2, 1, 8, 128>}]} {
    %0 = arith.index_cast %arg0 : i32 to index
    %c0 = arith.constant 0 : index
    %1 = memref.load %arg2[%0, %c0] : memref<2x22xf32, #tpu.memory_space<smem>>
    %2 = arith.index_cast %arg0 : i32 to index
    %c1 = arith.constant 1 : index
    %3 = memref.load %arg2[%2, %c1] : memref<2x22xf32, #tpu.memory_space<smem>>
    %4 = arith.index_cast %arg0 : i32 to index
    %c2 = arith.constant 2 : index
    %5 = memref.load %arg2[%4, %c2] : memref<2x22xf32, #tpu.memory_space<smem>>
    %6 = arith.index_cast %arg0 : i32 to index
    %c3 = arith.constant 3 : index
    %7 = memref.load %arg2[%6, %c3] : memref<2x22xf32, #tpu.memory_space<smem>>
    %8 = arith.index_cast %arg0 : i32 to index
    %c4 = arith.constant 4 : index
    %9 = memref.load %arg2[%8, %c4] : memref<2x22xf32, #tpu.memory_space<smem>>
    %10 = arith.index_cast %arg0 : i32 to index
    %c5 = arith.constant 5 : index
    %11 = memref.load %arg2[%10, %c5] : memref<2x22xf32, #tpu.memory_space<smem>>
    %12 = arith.index_cast %arg0 : i32 to index
    %c6 = arith.constant 6 : index
    %13 = memref.load %arg2[%12, %c6] : memref<2x22xf32, #tpu.memory_space<smem>>
    %14 = arith.index_cast %arg0 : i32 to index
    %c7 = arith.constant 7 : index
    %15 = memref.load %arg2[%14, %c7] : memref<2x22xf32, #tpu.memory_space<smem>>
    %16 = arith.index_cast %arg0 : i32 to index
    %c8 = arith.constant 8 : index
    %17 = memref.load %arg2[%16, %c8] : memref<2x22xf32, #tpu.memory_space<smem>>
    %18 = arith.index_cast %arg0 : i32 to index
    %c9 = arith.constant 9 : index
    %19 = memref.load %arg2[%18, %c9] : memref<2x22xf32, #tpu.memory_space<smem>>
    %20 = arith.index_cast %arg0 : i32 to index
    %c10 = arith.constant 10 : index
    %21 = memref.load %arg2[%20, %c10] : memref<2x22xf32, #tpu.memory_space<smem>>
    %22 = arith.index_cast %arg0 : i32 to index
    %c11 = arith.constant 11 : index
    %23 = memref.load %arg2[%22, %c11] : memref<2x22xf32, #tpu.memory_space<smem>>
    %24 = arith.index_cast %arg0 : i32 to index
    %c12 = arith.constant 12 : index
    %25 = memref.load %arg2[%24, %c12] : memref<2x22xf32, #tpu.memory_space<smem>>
    %26 = arith.index_cast %arg0 : i32 to index
    %c13 = arith.constant 13 : index
    %27 = memref.load %arg2[%26, %c13] : memref<2x22xf32, #tpu.memory_space<smem>>
    %28 = arith.index_cast %arg0 : i32 to index
    %c14 = arith.constant 14 : index
    %29 = memref.load %arg2[%28, %c14] : memref<2x22xf32, #tpu.memory_space<smem>>
    %30 = arith.index_cast %arg0 : i32 to index
    %c15 = arith.constant 15 : index
    %31 = memref.load %arg2[%30, %c15] : memref<2x22xf32, #tpu.memory_space<smem>>
    %32 = arith.index_cast %arg0 : i32 to index
    %c16 = arith.constant 16 : index
    %33 = memref.load %arg2[%32, %c16] : memref<2x22xf32, #tpu.memory_space<smem>>
    %34 = arith.index_cast %arg0 : i32 to index
    %c17 = arith.constant 17 : index
    %35 = memref.load %arg2[%34, %c17] : memref<2x22xf32, #tpu.memory_space<smem>>
    %36 = arith.index_cast %arg0 : i32 to index
    %c18 = arith.constant 18 : index
    %37 = memref.load %arg2[%36, %c18] : memref<2x22xf32, #tpu.memory_space<smem>>
    %38 = arith.index_cast %arg0 : i32 to index
    %c19 = arith.constant 19 : index
    %39 = memref.load %arg2[%38, %c19] : memref<2x22xf32, #tpu.memory_space<smem>>
    %40 = arith.index_cast %arg0 : i32 to index
    %c20 = arith.constant 20 : index
    %41 = memref.load %arg2[%40, %c20] : memref<2x22xf32, #tpu.memory_space<smem>>
    %42 = arith.index_cast %arg0 : i32 to index
    %c21 = arith.constant 21 : index
    %43 = memref.load %arg2[%42, %c21] : memref<2x22xf32, #tpu.memory_space<smem>>
    %c0_0 = arith.constant 0 : index
    %c0_1 = arith.constant 0 : index
    %c0_2 = arith.constant 0 : index
    %c0_3 = arith.constant 0 : index
    %44 = vector.load %arg3[%c0_0, %c0_1, %c0_2, %c0_3] : memref<2x1x8x128xf32, #tpu.memory_space<vmem>>, vector<1x1x8x128xf32>
    %45 = vector.shape_cast %44 : vector<1x1x8x128xf32> to vector<8x128xf32>
    %c1_4 = arith.constant 1 : index
    %c0_5 = arith.constant 0 : index
    %c0_6 = arith.constant 0 : index
    %c0_7 = arith.constant 0 : index
    %46 = vector.load %arg3[%c1_4, %c0_5, %c0_6, %c0_7] : memref<2x1x8x128xf32, #tpu.memory_space<vmem>>, vector<1x1x8x128xf32>
    %47 = vector.shape_cast %46 : vector<1x1x8x128xf32> to vector<8x128xf32>
    %48 = math.absf %45 : vector<8x128xf32>
    %49 = vector.broadcast %37 : f32 to vector<8x128xf32>
    %50 = arith.mulf %49, %48 : vector<8x128xf32>
    %51 = vector.broadcast %35 : f32 to vector<8x128xf32>
    %52 = arith.subf %51, %50 : vector<8x128xf32>
    %c0_8 = arith.constant 0 : index
    %c0_9 = arith.constant 0 : index
    %c0_10 = arith.constant 0 : index
    %c0_11 = arith.constant 0 : index
    %53 = vector.load %arg4[%c0_8, %c0_9, %c0_10, %c0_11] : memref<4x1x8x128xf32, #tpu.memory_space<vmem>>, vector<1x1x8x128xf32>
    %54 = vector.shape_cast %53 : vector<1x1x8x128xf32> to vector<8x128xf32>
    %cst = arith.constant 0.000000e+00 : f32
    %cst_12 = arith.constant 1.000000e+00 : f32
    %55 = vector.broadcast %cst : f32 to vector<8x128xf32>
    %56 = arith.maximumf %55, %54 : vector<8x128xf32>
    %57 = vector.broadcast %cst_12 : f32 to vector<8x128xf32>
    %58 = arith.minimumf %57, %56 : vector<8x128xf32>
    %59 = vector.broadcast %1 : f32 to vector<8x128xf32>
    %60 = arith.mulf %59, %58 : vector<8x128xf32>
    %61 = vector.broadcast %33 : f32 to vector<8x128xf32>
    %62 = arith.addf %61, %60 : vector<8x128xf32>
    %63 = vector.broadcast %17 : f32 to vector<8x128xf32>
    %64 = arith.mulf %63, %58 : vector<8x128xf32>
    %65 = vector.broadcast %9 : f32 to vector<8x128xf32>
    %66 = arith.addf %65, %64 : vector<8x128xf32>
    %67 = vector.broadcast %25 : f32 to vector<8x128xf32>
    %68 = arith.mulf %67, %48 : vector<8x128xf32>
    %69 = arith.subf %66, %68 : vector<8x128xf32>
    %70 = arith.mulf %69, %58 : vector<8x128xf32>
    %71 = arith.addf %52, %70 : vector<8x128xf32>
    %c1_13 = arith.constant 1 : index
    %c0_14 = arith.constant 0 : index
    %c0_15 = arith.constant 0 : index
    %c0_16 = arith.constant 0 : index
    %72 = vector.load %arg4[%c1_13, %c0_14, %c0_15, %c0_16] : memref<4x1x8x128xf32, #tpu.memory_space<vmem>>, vector<1x1x8x128xf32>
    %73 = vector.shape_cast %72 : vector<1x1x8x128xf32> to vector<8x128xf32>
    %cst_17 = arith.constant 0.000000e+00 : f32
    %cst_18 = arith.constant 1.000000e+00 : f32
    %74 = vector.broadcast %cst_17 : f32 to vector<8x128xf32>
    %75 = arith.maximumf %74, %73 : vector<8x128xf32>
    %76 = vector.broadcast %cst_18 : f32 to vector<8x128xf32>
    %77 = arith.minimumf %76, %75 : vector<8x128xf32>
    %78 = vector.broadcast %3 : f32 to vector<8x128xf32>
    %79 = arith.mulf %78, %77 : vector<8x128xf32>
    %80 = arith.addf %62, %79 : vector<8x128xf32>
    %81 = vector.broadcast %19 : f32 to vector<8x128xf32>
    %82 = arith.mulf %81, %77 : vector<8x128xf32>
    %83 = vector.broadcast %11 : f32 to vector<8x128xf32>
    %84 = arith.addf %83, %82 : vector<8x128xf32>
    %85 = vector.broadcast %27 : f32 to vector<8x128xf32>
    %86 = arith.mulf %85, %48 : vector<8x128xf32>
    %87 = arith.subf %84, %86 : vector<8x128xf32>
    %88 = arith.mulf %87, %77 : vector<8x128xf32>
    %89 = arith.addf %71, %88 : vector<8x128xf32>
    %c2_19 = arith.constant 2 : index
    %c0_20 = arith.constant 0 : index
    %c0_21 = arith.constant 0 : index
    %c0_22 = arith.constant 0 : index
    %90 = vector.load %arg4[%c2_19, %c0_20, %c0_21, %c0_22] : memref<4x1x8x128xf32, #tpu.memory_space<vmem>>, vector<1x1x8x128xf32>
    %91 = vector.shape_cast %90 : vector<1x1x8x128xf32> to vector<8x128xf32>
    %cst_23 = arith.constant 0.000000e+00 : f32
    %cst_24 = arith.constant 1.000000e+00 : f32
    %92 = vector.broadcast %cst_23 : f32 to vector<8x128xf32>
    %93 = arith.maximumf %92, %91 : vector<8x128xf32>
    %94 = vector.broadcast %cst_24 : f32 to vector<8x128xf32>
    %95 = arith.minimumf %94, %93 : vector<8x128xf32>
    %96 = vector.broadcast %5 : f32 to vector<8x128xf32>
    %97 = arith.mulf %96, %95 : vector<8x128xf32>
    %98 = arith.addf %80, %97 : vector<8x128xf32>
    %99 = vector.broadcast %21 : f32 to vector<8x128xf32>
    %100 = arith.mulf %99, %95 : vector<8x128xf32>
    %101 = vector.broadcast %13 : f32 to vector<8x128xf32>
    %102 = arith.addf %101, %100 : vector<8x128xf32>
    %103 = vector.broadcast %29 : f32 to vector<8x128xf32>
    %104 = arith.mulf %103, %48 : vector<8x128xf32>
    %105 = arith.subf %102, %104 : vector<8x128xf32>
    %106 = arith.mulf %105, %95 : vector<8x128xf32>
    %107 = arith.addf %89, %106 : vector<8x128xf32>
    %c3_25 = arith.constant 3 : index
    %c0_26 = arith.constant 0 : index
    %c0_27 = arith.constant 0 : index
    %c0_28 = arith.constant 0 : index
    %108 = vector.load %arg4[%c3_25, %c0_26, %c0_27, %c0_28] : memref<4x1x8x128xf32, #tpu.memory_space<vmem>>, vector<1x1x8x128xf32>
    %109 = vector.shape_cast %108 : vector<1x1x8x128xf32> to vector<8x128xf32>
    %cst_29 = arith.constant 0.000000e+00 : f32
    %cst_30 = arith.constant 1.000000e+00 : f32
    %110 = vector.broadcast %cst_29 : f32 to vector<8x128xf32>
    %111 = arith.maximumf %110, %109 : vector<8x128xf32>
    %112 = vector.broadcast %cst_30 : f32 to vector<8x128xf32>
    %113 = arith.minimumf %112, %111 : vector<8x128xf32>
    %114 = vector.broadcast %7 : f32 to vector<8x128xf32>
    %115 = arith.mulf %114, %113 : vector<8x128xf32>
    %116 = arith.addf %98, %115 : vector<8x128xf32>
    %117 = vector.broadcast %23 : f32 to vector<8x128xf32>
    %118 = arith.mulf %117, %113 : vector<8x128xf32>
    %119 = vector.broadcast %15 : f32 to vector<8x128xf32>
    %120 = arith.addf %119, %118 : vector<8x128xf32>
    %121 = vector.broadcast %31 : f32 to vector<8x128xf32>
    %122 = arith.mulf %121, %48 : vector<8x128xf32>
    %123 = arith.subf %120, %122 : vector<8x128xf32>
    %124 = arith.mulf %123, %113 : vector<8x128xf32>
    %125 = arith.addf %107, %124 : vector<8x128xf32>
    %126 = vector.broadcast %39 : f32 to vector<8x128xf32>
    %127 = arith.mulf %116, %126 : vector<8x128xf32>
    %128 = vector.broadcast %43 : f32 to vector<8x128xf32>
    %129 = arith.addf %127, %128 : vector<8x128xf32>
    %cst_31 = arith.constant 0.000000e+00 : f32
    %130 = vector.broadcast %cst_31 : f32 to vector<8x128xf32>
    %131 = arith.subf %130, %129 : vector<8x128xf32>
    %132 = vector.broadcast %39 : f32 to vector<8x128xf32>
    %133 = arith.mulf %116, %132 : vector<8x128xf32>
    %134 = math.sqrt %133 : vector<8x128xf32>
    %cst_32 = arith.constant 2.000000e+00 : f32
    %135 = vector.broadcast %cst_32 : f32 to vector<8x128xf32>
    %136 = arith.mulf %135, %134 : vector<8x128xf32>
    %137 = vector.broadcast %41 : f32 to vector<8x128xf32>
    %138 = arith.addf %136, %137 : vector<8x128xf32>
    %cst_33 = arith.constant 0.000000e+00 : f32
    %139 = vector.broadcast %cst_33 : f32 to vector<8x128xf32>
    %140 = arith.subf %139, %138 : vector<8x128xf32>
    %cst_34 = arith.constant 1.666670e-02 : f32
    %141 = arith.mulf %39, %cst_34 : f32
    %142 = vector.broadcast %141 : f32 to vector<8x128xf32>
    %143 = arith.mulf %125, %142 : vector<8x128xf32>
    %cst_35 = arith.constant 0.0020833374 : f32
    %144 = vector.broadcast %cst_35 : f32 to vector<8x128xf32>
    %145 = arith.mulf %131, %144 : vector<8x128xf32>
    %cst_36 = arith.constant 0.0020833374 : f32
    %146 = vector.broadcast %cst_36 : f32 to vector<8x128xf32>
    %147 = arith.mulf %140, %146 : vector<8x128xf32>
    %cst_37 = arith.constant 0.0010416687 : f32
    %148 = vector.broadcast %cst_37 : f32 to vector<8x128xf32>
    %149 = arith.mulf %148, %145 : vector<8x128xf32>
    %cst_38 = arith.constant 0.0010416687 : f32
    %150 = vector.broadcast %cst_38 : f32 to vector<8x128xf32>
    %151 = arith.mulf %150, %147 : vector<8x128xf32>
    %152 = arith.mulf %145, %147 : vector<8x128xf32>
    %cst_39 = arith.constant 5.000000e-01 : f32
    %153 = vector.broadcast %cst_39 : f32 to vector<8x128xf32>
    %154 = arith.mulf %153, %152 : vector<8x128xf32>
    %155 = arith.mulf %147, %147 : vector<8x128xf32>
    %cst_40 = arith.constant 5.000000e-01 : f32
    %156 = vector.broadcast %cst_40 : f32 to vector<8x128xf32>
    %157 = arith.mulf %156, %155 : vector<8x128xf32>
    %158 = arith.addf %149, %157 : vector<8x128xf32>
    %cst_41 = arith.constant 1.000000e+00 : f32
    %159 = vector.broadcast %cst_41 : f32 to vector<8x128xf32>
    %160 = arith.addf %159, %149 : vector<8x128xf32>
    %cst_42 = arith.constant 0.0020833374 : f32
    %161 = vector.broadcast %cst_42 : f32 to vector<8x128xf32>
    %162 = arith.addf %161, %151 : vector<8x128xf32>
    %163 = arith.addf %145, %154 : vector<8x128xf32>
    %cst_43 = arith.constant 1.000000e+00 : f32
    %164 = vector.broadcast %cst_43 : f32 to vector<8x128xf32>
    %165 = arith.addf %164, %147 : vector<8x128xf32>
    %166 = arith.addf %165, %158 : vector<8x128xf32>
    %cst_44 = arith.constant 0.333333343 : f32
    %167 = vector.broadcast %cst_44 : f32 to vector<8x128xf32>
    %168 = arith.mulf %151, %167 : vector<8x128xf32>
    %cst_45 = arith.constant 0.0010416687 : f32
    %169 = vector.broadcast %cst_45 : f32 to vector<8x128xf32>
    %170 = arith.addf %169, %168 : vector<8x128xf32>
    %cst_46 = arith.constant 5.000000e-01 : f32
    %171 = vector.broadcast %cst_46 : f32 to vector<8x128xf32>
    %172 = arith.mulf %171, %147 : vector<8x128xf32>
    %cst_47 = arith.constant 1.000000e+00 : f32
    %173 = vector.broadcast %cst_47 : f32 to vector<8x128xf32>
    %174 = arith.addf %173, %172 : vector<8x128xf32>
    %cst_48 = arith.constant 0.333333343 : f32
    %175 = vector.broadcast %cst_48 : f32 to vector<8x128xf32>
    %176 = arith.mulf %158, %175 : vector<8x128xf32>
    %177 = arith.addf %174, %176 : vector<8x128xf32>
    %178 = arith.mulf %151, %145 : vector<8x128xf32>
    %cst_49 = arith.constant 0.333333343 : f32
    %179 = vector.broadcast %cst_49 : f32 to vector<8x128xf32>
    %180 = arith.mulf %178, %179 : vector<8x128xf32>
    %cst_50 = arith.constant 0.0020833374 : f32
    %181 = vector.broadcast %cst_50 : f32 to vector<8x128xf32>
    %182 = arith.mulf %149, %181 : vector<8x128xf32>
    %183 = arith.mulf %151, %147 : vector<8x128xf32>
    %184 = arith.addf %182, %183 : vector<8x128xf32>
    %cst_51 = arith.constant 0.333333343 : f32
    %185 = vector.broadcast %cst_51 : f32 to vector<8x128xf32>
    %186 = arith.mulf %184, %185 : vector<8x128xf32>
    %187 = arith.mulf %158, %145 : vector<8x128xf32>
    %cst_52 = arith.constant 0.333333343 : f32
    %188 = vector.broadcast %cst_52 : f32 to vector<8x128xf32>
    %189 = arith.mulf %187, %188 : vector<8x128xf32>
    %cst_53 = arith.constant 0.0020833374 : f32
    %190 = vector.broadcast %cst_53 : f32 to vector<8x128xf32>
    %191 = arith.mulf %154, %190 : vector<8x128xf32>
    %192 = arith.mulf %158, %147 : vector<8x128xf32>
    %193 = arith.addf %191, %192 : vector<8x128xf32>
    %cst_54 = arith.constant 0.333333343 : f32
    %194 = vector.broadcast %cst_54 : f32 to vector<8x128xf32>
    %195 = arith.mulf %193, %194 : vector<8x128xf32>
    %196 = arith.addf %160, %180 : vector<8x128xf32>
    %197 = arith.addf %162, %186 : vector<8x128xf32>
    %198 = arith.addf %163, %189 : vector<8x128xf32>
    %199 = arith.addf %166, %195 : vector<8x128xf32>
    %cst_55 = arith.constant 2.500000e-01 : f32
    %200 = vector.broadcast %cst_55 : f32 to vector<8x128xf32>
    %201 = arith.mulf %186, %200 : vector<8x128xf32>
    %202 = arith.addf %170, %201 : vector<8x128xf32>
    %cst_56 = arith.constant 2.500000e-01 : f32
    %203 = vector.broadcast %cst_56 : f32 to vector<8x128xf32>
    %204 = arith.mulf %195, %203 : vector<8x128xf32>
    %205 = arith.addf %177, %204 : vector<8x128xf32>
    %206 = arith.mulf %186, %145 : vector<8x128xf32>
    %cst_57 = arith.constant 2.500000e-01 : f32
    %207 = vector.broadcast %cst_57 : f32 to vector<8x128xf32>
    %208 = arith.mulf %206, %207 : vector<8x128xf32>
    %cst_58 = arith.constant 0.0020833374 : f32
    %209 = vector.broadcast %cst_58 : f32 to vector<8x128xf32>
    %210 = arith.mulf %180, %209 : vector<8x128xf32>
    %211 = arith.mulf %186, %147 : vector<8x128xf32>
    %212 = arith.addf %210, %211 : vector<8x128xf32>
    %cst_59 = arith.constant 2.500000e-01 : f32
    %213 = vector.broadcast %cst_59 : f32 to vector<8x128xf32>
    %214 = arith.mulf %212, %213 : vector<8x128xf32>
    %215 = arith.mulf %195, %145 : vector<8x128xf32>
    %cst_60 = arith.constant 2.500000e-01 : f32
    %216 = vector.broadcast %cst_60 : f32 to vector<8x128xf32>
    %217 = arith.mulf %215, %216 : vector<8x128xf32>
    %cst_61 = arith.constant 0.0020833374 : f32
    %218 = vector.broadcast %cst_61 : f32 to vector<8x128xf32>
    %219 = arith.mulf %189, %218 : vector<8x128xf32>
    %220 = arith.mulf %195, %147 : vector<8x128xf32>
    %221 = arith.addf %219, %220 : vector<8x128xf32>
    %cst_62 = arith.constant 2.500000e-01 : f32
    %222 = vector.broadcast %cst_62 : f32 to vector<8x128xf32>
    %223 = arith.mulf %221, %222 : vector<8x128xf32>
    %224 = arith.addf %196, %208 : vector<8x128xf32>
    %225 = arith.addf %197, %214 : vector<8x128xf32>
    %226 = arith.addf %198, %217 : vector<8x128xf32>
    %227 = arith.addf %199, %223 : vector<8x128xf32>
    %cst_63 = arith.constant 2.000000e-01 : f32
    %228 = vector.broadcast %cst_63 : f32 to vector<8x128xf32>
    %229 = arith.mulf %214, %228 : vector<8x128xf32>
    %230 = arith.addf %202, %229 : vector<8x128xf32>
    %cst_64 = arith.constant 2.000000e-01 : f32
    %231 = vector.broadcast %cst_64 : f32 to vector<8x128xf32>
    %232 = arith.mulf %223, %231 : vector<8x128xf32>
    %233 = arith.addf %205, %232 : vector<8x128xf32>
    %234 = arith.mulf %214, %145 : vector<8x128xf32>
    %cst_65 = arith.constant 2.000000e-01 : f32
    %235 = vector.broadcast %cst_65 : f32 to vector<8x128xf32>
    %236 = arith.mulf %234, %235 : vector<8x128xf32>
    %cst_66 = arith.constant 0.0020833374 : f32
    %237 = vector.broadcast %cst_66 : f32 to vector<8x128xf32>
    %238 = arith.mulf %208, %237 : vector<8x128xf32>
    %239 = arith.mulf %214, %147 : vector<8x128xf32>
    %240 = arith.addf %238, %239 : vector<8x128xf32>
    %cst_67 = arith.constant 2.000000e-01 : f32
    %241 = vector.broadcast %cst_67 : f32 to vector<8x128xf32>
    %242 = arith.mulf %240, %241 : vector<8x128xf32>
    %243 = arith.mulf %223, %145 : vector<8x128xf32>
    %cst_68 = arith.constant 2.000000e-01 : f32
    %244 = vector.broadcast %cst_68 : f32 to vector<8x128xf32>
    %245 = arith.mulf %243, %244 : vector<8x128xf32>
    %cst_69 = arith.constant 0.0020833374 : f32
    %246 = vector.broadcast %cst_69 : f32 to vector<8x128xf32>
    %247 = arith.mulf %217, %246 : vector<8x128xf32>
    %248 = arith.mulf %223, %147 : vector<8x128xf32>
    %249 = arith.addf %247, %248 : vector<8x128xf32>
    %cst_70 = arith.constant 2.000000e-01 : f32
    %250 = vector.broadcast %cst_70 : f32 to vector<8x128xf32>
    %251 = arith.mulf %249, %250 : vector<8x128xf32>
    %252 = arith.addf %224, %236 : vector<8x128xf32>
    %253 = arith.addf %225, %242 : vector<8x128xf32>
    %254 = arith.addf %226, %245 : vector<8x128xf32>
    %255 = arith.addf %227, %251 : vector<8x128xf32>
    %cst_71 = arith.constant 0.166666672 : f32
    %256 = vector.broadcast %cst_71 : f32 to vector<8x128xf32>
    %257 = arith.mulf %242, %256 : vector<8x128xf32>
    %258 = arith.addf %230, %257 : vector<8x128xf32>
    %cst_72 = arith.constant 0.166666672 : f32
    %259 = vector.broadcast %cst_72 : f32 to vector<8x128xf32>
    %260 = arith.mulf %251, %259 : vector<8x128xf32>
    %261 = arith.addf %233, %260 : vector<8x128xf32>
    %262 = arith.mulf %242, %145 : vector<8x128xf32>
    %cst_73 = arith.constant 0.166666672 : f32
    %263 = vector.broadcast %cst_73 : f32 to vector<8x128xf32>
    %264 = arith.mulf %262, %263 : vector<8x128xf32>
    %cst_74 = arith.constant 0.0020833374 : f32
    %265 = vector.broadcast %cst_74 : f32 to vector<8x128xf32>
    %266 = arith.mulf %236, %265 : vector<8x128xf32>
    %267 = arith.mulf %242, %147 : vector<8x128xf32>
    %268 = arith.addf %266, %267 : vector<8x128xf32>
    %cst_75 = arith.constant 0.166666672 : f32
    %269 = vector.broadcast %cst_75 : f32 to vector<8x128xf32>
    %270 = arith.mulf %268, %269 : vector<8x128xf32>
    %271 = arith.mulf %251, %145 : vector<8x128xf32>
    %cst_76 = arith.constant 0.166666672 : f32
    %272 = vector.broadcast %cst_76 : f32 to vector<8x128xf32>
    %273 = arith.mulf %271, %272 : vector<8x128xf32>
    %cst_77 = arith.constant 0.0020833374 : f32
    %274 = vector.broadcast %cst_77 : f32 to vector<8x128xf32>
    %275 = arith.mulf %245, %274 : vector<8x128xf32>
    %276 = arith.mulf %251, %147 : vector<8x128xf32>
    %277 = arith.addf %275, %276 : vector<8x128xf32>
    %cst_78 = arith.constant 0.166666672 : f32
    %278 = vector.broadcast %cst_78 : f32 to vector<8x128xf32>
    %279 = arith.mulf %277, %278 : vector<8x128xf32>
    %280 = arith.addf %252, %264 : vector<8x128xf32>
    %281 = arith.addf %253, %270 : vector<8x128xf32>
    %282 = arith.addf %254, %273 : vector<8x128xf32>
    %283 = arith.addf %255, %279 : vector<8x128xf32>
    %cst_79 = arith.constant 0.142857149 : f32
    %284 = vector.broadcast %cst_79 : f32 to vector<8x128xf32>
    %285 = arith.mulf %270, %284 : vector<8x128xf32>
    %286 = arith.addf %258, %285 : vector<8x128xf32>
    %cst_80 = arith.constant 0.142857149 : f32
    %287 = vector.broadcast %cst_80 : f32 to vector<8x128xf32>
    %288 = arith.mulf %279, %287 : vector<8x128xf32>
    %289 = arith.addf %261, %288 : vector<8x128xf32>
    %290 = arith.mulf %270, %145 : vector<8x128xf32>
    %cst_81 = arith.constant 0.142857149 : f32
    %291 = vector.broadcast %cst_81 : f32 to vector<8x128xf32>
    %292 = arith.mulf %290, %291 : vector<8x128xf32>
    %cst_82 = arith.constant 0.0020833374 : f32
    %293 = vector.broadcast %cst_82 : f32 to vector<8x128xf32>
    %294 = arith.mulf %264, %293 : vector<8x128xf32>
    %295 = arith.mulf %270, %147 : vector<8x128xf32>
    %296 = arith.addf %294, %295 : vector<8x128xf32>
    %cst_83 = arith.constant 0.142857149 : f32
    %297 = vector.broadcast %cst_83 : f32 to vector<8x128xf32>
    %298 = arith.mulf %296, %297 : vector<8x128xf32>
    %299 = arith.mulf %279, %145 : vector<8x128xf32>
    %cst_84 = arith.constant 0.142857149 : f32
    %300 = vector.broadcast %cst_84 : f32 to vector<8x128xf32>
    %301 = arith.mulf %299, %300 : vector<8x128xf32>
    %cst_85 = arith.constant 0.0020833374 : f32
    %302 = vector.broadcast %cst_85 : f32 to vector<8x128xf32>
    %303 = arith.mulf %273, %302 : vector<8x128xf32>
    %304 = arith.mulf %279, %147 : vector<8x128xf32>
    %305 = arith.addf %303, %304 : vector<8x128xf32>
    %cst_86 = arith.constant 0.142857149 : f32
    %306 = vector.broadcast %cst_86 : f32 to vector<8x128xf32>
    %307 = arith.mulf %305, %306 : vector<8x128xf32>
    %308 = arith.addf %280, %292 : vector<8x128xf32>
    %309 = arith.addf %281, %298 : vector<8x128xf32>
    %310 = arith.addf %282, %301 : vector<8x128xf32>
    %311 = arith.addf %283, %307 : vector<8x128xf32>
    %cst_87 = arith.constant 1.250000e-01 : f32
    %312 = vector.broadcast %cst_87 : f32 to vector<8x128xf32>
    %313 = arith.mulf %298, %312 : vector<8x128xf32>
    %314 = arith.addf %286, %313 : vector<8x128xf32>
    %cst_88 = arith.constant 1.250000e-01 : f32
    %315 = vector.broadcast %cst_88 : f32 to vector<8x128xf32>
    %316 = arith.mulf %307, %315 : vector<8x128xf32>
    %317 = arith.addf %289, %316 : vector<8x128xf32>
    %cst_89 = arith.constant 1.000000e+00 : f32
    %318 = vector.broadcast %cst_89 : f32 to vector<8x128xf32>
    %319 = arith.addf %308, %318 : vector<8x128xf32>
    %320 = arith.mulf %319, %314 : vector<8x128xf32>
    %321 = arith.mulf %309, %317 : vector<8x128xf32>
    %322 = arith.addf %320, %321 : vector<8x128xf32>
    %cst_90 = arith.constant 5.000000e-01 : f32
    %323 = vector.broadcast %cst_90 : f32 to vector<8x128xf32>
    %324 = arith.mulf %322, %323 : vector<8x128xf32>
    %325 = arith.mulf %310, %314 : vector<8x128xf32>
    %cst_91 = arith.constant 1.000000e+00 : f32
    %326 = vector.broadcast %cst_91 : f32 to vector<8x128xf32>
    %327 = arith.addf %311, %326 : vector<8x128xf32>
    %328 = arith.mulf %327, %317 : vector<8x128xf32>
    %329 = arith.addf %325, %328 : vector<8x128xf32>
    %cst_92 = arith.constant 5.000000e-01 : f32
    %330 = vector.broadcast %cst_92 : f32 to vector<8x128xf32>
    %331 = arith.mulf %329, %330 : vector<8x128xf32>
    %332 = arith.addf %308, %311 : vector<8x128xf32>
    %333 = arith.mulf %309, %310 : vector<8x128xf32>
    %334 = arith.mulf %308, %308 : vector<8x128xf32>
    %335 = arith.addf %334, %333 : vector<8x128xf32>
    %336 = arith.mulf %311, %311 : vector<8x128xf32>
    %337 = arith.addf %336, %333 : vector<8x128xf32>
    %338 = arith.mulf %309, %332 : vector<8x128xf32>
    %339 = arith.mulf %310, %332 : vector<8x128xf32>
    %cst_93 = arith.constant 1.000000e+00 : f32
    %340 = vector.broadcast %cst_93 : f32 to vector<8x128xf32>
    %341 = arith.addf %335, %340 : vector<8x128xf32>
    %342 = arith.mulf %341, %324 : vector<8x128xf32>
    %343 = arith.mulf %338, %331 : vector<8x128xf32>
    %344 = arith.addf %342, %343 : vector<8x128xf32>
    %cst_94 = arith.constant 5.000000e-01 : f32
    %345 = vector.broadcast %cst_94 : f32 to vector<8x128xf32>
    %346 = arith.mulf %344, %345 : vector<8x128xf32>
    %347 = arith.mulf %339, %324 : vector<8x128xf32>
    %cst_95 = arith.constant 1.000000e+00 : f32
    %348 = vector.broadcast %cst_95 : f32 to vector<8x128xf32>
    %349 = arith.addf %337, %348 : vector<8x128xf32>
    %350 = arith.mulf %349, %331 : vector<8x128xf32>
    %351 = arith.addf %347, %350 : vector<8x128xf32>
    %cst_96 = arith.constant 5.000000e-01 : f32
    %352 = vector.broadcast %cst_96 : f32 to vector<8x128xf32>
    %353 = arith.mulf %351, %352 : vector<8x128xf32>
    %354 = arith.addf %335, %337 : vector<8x128xf32>
    %355 = arith.mulf %338, %339 : vector<8x128xf32>
    %356 = arith.mulf %335, %335 : vector<8x128xf32>
    %357 = arith.addf %356, %355 : vector<8x128xf32>
    %358 = arith.mulf %337, %337 : vector<8x128xf32>
    %359 = arith.addf %358, %355 : vector<8x128xf32>
    %360 = arith.mulf %338, %354 : vector<8x128xf32>
    %361 = arith.mulf %339, %354 : vector<8x128xf32>
    %cst_97 = arith.constant 1.000000e+00 : f32
    %362 = vector.broadcast %cst_97 : f32 to vector<8x128xf32>
    %363 = arith.addf %357, %362 : vector<8x128xf32>
    %364 = arith.mulf %363, %346 : vector<8x128xf32>
    %365 = arith.mulf %360, %353 : vector<8x128xf32>
    %366 = arith.addf %364, %365 : vector<8x128xf32>
    %cst_98 = arith.constant 5.000000e-01 : f32
    %367 = vector.broadcast %cst_98 : f32 to vector<8x128xf32>
    %368 = arith.mulf %366, %367 : vector<8x128xf32>
    %369 = arith.mulf %361, %346 : vector<8x128xf32>
    %cst_99 = arith.constant 1.000000e+00 : f32
    %370 = vector.broadcast %cst_99 : f32 to vector<8x128xf32>
    %371 = arith.addf %359, %370 : vector<8x128xf32>
    %372 = arith.mulf %371, %353 : vector<8x128xf32>
    %373 = arith.addf %369, %372 : vector<8x128xf32>
    %cst_100 = arith.constant 5.000000e-01 : f32
    %374 = vector.broadcast %cst_100 : f32 to vector<8x128xf32>
    %375 = arith.mulf %373, %374 : vector<8x128xf32>
    %376 = arith.addf %357, %359 : vector<8x128xf32>
    %377 = arith.mulf %360, %361 : vector<8x128xf32>
    %378 = arith.mulf %357, %357 : vector<8x128xf32>
    %379 = arith.addf %378, %377 : vector<8x128xf32>
    %380 = arith.mulf %359, %359 : vector<8x128xf32>
    %381 = arith.addf %380, %377 : vector<8x128xf32>
    %382 = arith.mulf %360, %376 : vector<8x128xf32>
    %383 = arith.mulf %361, %376 : vector<8x128xf32>
    %384 = arith.mulf %379, %45 : vector<8x128xf32>
    %385 = arith.mulf %382, %47 : vector<8x128xf32>
    %386 = arith.addf %384, %385 : vector<8x128xf32>
    %387 = arith.mulf %368, %143 : vector<8x128xf32>
    %388 = arith.addf %386, %387 : vector<8x128xf32>
    %389 = arith.mulf %383, %45 : vector<8x128xf32>
    %390 = arith.mulf %381, %47 : vector<8x128xf32>
    %391 = arith.addf %389, %390 : vector<8x128xf32>
    %392 = arith.mulf %375, %143 : vector<8x128xf32>
    %393 = arith.addf %391, %392 : vector<8x128xf32>
    %c0_101 = arith.constant 0 : index
    %c0_102 = arith.constant 0 : index
    %c0_103 = arith.constant 0 : index
    %c0_104 = arith.constant 0 : index
    %394 = vector.load %arg5[%c0_101, %c0_102, %c0_103, %c0_104] : memref<2x1x8x128xf32, #tpu.memory_space<vmem>>, vector<1x1x8x128xf32>
    %395 = vector.shape_cast %394 : vector<1x1x8x128xf32> to vector<8x128xf32>
    %396 = vector.shape_cast %388 : vector<8x128xf32> to vector<1x1x8x128xf32>
    tpu.vector_store %arg5[%c0_101, %c0_102, %c0_103, %c0_104], %396 {strides = array<i32>} : memref<2x1x8x128xf32, #tpu.memory_space<vmem>>, vector<1x1x8x128xf32>,
    %c1_105 = arith.constant 1 : index
    %c0_106 = arith.constant 0 : index
    %c0_107 = arith.constant 0 : index
    %c0_108 = arith.constant 0 : index
    %397 = vector.load %arg5[%c1_105, %c0_106, %c0_107, %c0_108] : memref<2x1x8x128xf32, #tpu.memory_space<vmem>>, vector<1x1x8x128xf32>
    %398 = vector.shape_cast %397 : vector<1x1x8x128xf32> to vector<8x128xf32>
    %399 = vector.shape_cast %393 : vector<8x128xf32> to vector<1x1x8x128xf32>
    tpu.vector_store %arg5[%c1_105, %c0_106, %c0_107, %c0_108], %399 {strides = array<i32>} : memref<2x1x8x128xf32, #tpu.memory_space<vmem>>, vector<1x1x8x128xf32>,
    return
  }
  func.func @transform_0(%arg0: i32, %arg1: i32) -> (i32, i32) {
    %c0_i32 = arith.constant 0 : i32
    %c0_i32_0 = arith.constant 0 : i32
    %c0_i32_1 = arith.constant 0 : i32
    return %c0_i32, %c0_i32_0 : i32, i32
  }
  func.func @transform_1(%arg0: i32, %arg1: i32) -> (i32, i32, i32, i32) {
    %c0_i32 = arith.constant 0 : i32
    %c0_i32_0 = arith.constant 0 : i32
    %c0_i32_1 = arith.constant 0 : i32
    return %c0_i32, %arg0, %arg1, %c0_i32_0 : i32, i32, i32, i32
  }
  func.func @transform_2(%arg0: i32, %arg1: i32) -> (i32, i32, i32, i32) {
    %c0_i32 = arith.constant 0 : i32
    %c0_i32_0 = arith.constant 0 : i32
    %c0_i32_1 = arith.constant 0 : i32
    return %c0_i32, %arg0, %arg1, %c0_i32_0 : i32, i32, i32, i32
  }
  func.func @transform_3(%arg0: i32, %arg1: i32) -> (i32, i32, i32, i32) {
    %c0_i32 = arith.constant 0 : i32
    %c0_i32_0 = arith.constant 0 : i32
    %c0_i32_1 = arith.constant 0 : i32
    return %c0_i32, %arg0, %arg1, %c0_i32_0 : i32, i32, i32, i32
  }
}

</mosaic_0001>

<bundles_post_ra>
// kernel: tpu_custom_call.1
= control target key start
LH: loop header
LB: loop body
LE: loop exit
PB: predicated region body
PF: predicated region fallthrough
CT: control target
= control target key end

     0   :  { %s1406_s0 = inlined_call_operand.hbm [shape: f32[2,22], index: 0, kind: input, shape index: {}]   ;;  %s1407_s1 = inlined_call_operand.hbm [shape: f32[2,2,8,128], index: 1, kind: input, shape index: {}]   ;;  %s1408_s2 = inlined_call_operand.hbm [shape: f32[4,2,8,128], index: 2, kind: input, shape index: {}]   ;;  %s1409_s3 = inlined_call_operand.hbm [shape: f32[2,2,8,128], index: 3, kind: output, shape index: {}]  }
   0x1   :  { %1417 = sst [smem:[#allocation16_spill]] %s1406_s0 }
   0x2   :  { %1418 = sst [smem:[#allocation17_spill]] %s1407_s1 }
   0x3   :  { %1419 = sst [smem:[#allocation18_spill]] %s1408_s2 }
   0x4   :  { %8 = vsyncpa [#allocation5], 0 }
   0x5   :  { %9 = vsyncpa [#allocation3], 0 }
   0x6   :  { %11 = vsyncpa [#allocation3 + $0x1], 0 }
   0x7   :  { %12 = vsyncpa [#allocation8], 0 }
   0x8   :  { %14 = vsyncpa [#allocation8 + $0x1], 0 }
   0x9   :  { %15 = vsyncpa [#allocation4], 0 }
   0xa   :  { %17 = vsyncpa [#allocation4 + $0x1], 0  ;;  %s1019_s12 = smov 0   ;;  %s1021_s13 = smov 0  }
   0xb   :  { %s1023_s14 = smov 0   ;;  %s1025_s15 = smov 0  }
   0xc   :  { %s1027_s16 = smov 0   ;;  %s1029_s17 = smov 0  }
   0xd LB: > { %1420 = sst [smem:[#allocation14_spill]] %s983_s16  ;;  %s714_s18 = sadd.s32 4294967295, %s987_s17   ;;  %s987_s17 = sphi %s1029_s17, %s23_s17   ;;  %s983_s16 = sphi %s1027_s16, %s1438_s16   ;;  %s979_s15 = sphi %s1025_s15, %s1437_s15   ;;  %s975_s14 = sphi %s1023_s14, %s1441_s14   ;;  %s971_s13 = sphi %s1021_s13, %s1440_s13   ;;  %s967_s12 = sphi %s1019_s12, %s1439_s12  }
   0xe   : > { %s715_s19 = sadd.s32 4294967294, %s987_s17   ;;  %s65_s20 = sadd.s32 1, %s975_s14 }
   0xf   : > { %p72_p0 = scmp.ne.s32.totalorder %s975_s14, %s971_s13  ;;  %p73_p1 = scmp.eq.s32.totalorder %s987_s17, 0 }
  0x10   : > { %p78_p2 = scmp.ne.s32.totalorder %s971_s13, %s967_s12  ;;  %p1057_p3 = scmp.eq.s32.totalorder %s714_s18, 0 }
  0x11   : > { %p132_p4 = scmp.eq.s32.totalorder %s714_s18, 1  ;;  %p74_p5 = por %p73_p1, %p72_p0 }
  0x12   : > { %s1421_s21 = scalar_select %p1057_p3, 1, 0 }
  0x13   : > { %p138_p6 = scmp.eq.s32.totalorder %s715_s19, 1  ;;  %p1063_p7 = por %p1057_p3, %p78_p2 }
  0x14   : > { %p1067_p8 = por %p132_p4, %p72_p0  ;;  %p716_p10 = scmp.ge.s32.totalorder %s987_s17, 1 }
  0x15   : > { %s1422_s22 = scalar_select %p1063_p7, 1, 0 }
  0x16   : > { %s1423_s23 = scalar_select %p1067_p8, 1, 0 }
  0x17   : > { %p1071_p9 = por %p138_p6, %p78_p2  ;;  %p145_p11 = scmp.lt.s32.totalorder %s987_s17, 3 }
  0x18   : > { %p764_p1 = scmp.lt.s32.totalorder %s987_s17, 2  ;;  %s1084_s26 = sand.u32 1, %s975_s14  }
  0x19   : > { %s1424_s24 = scalar_select %p1071_p9, 1, 0 }
  0x1a   : > { %p1078_p13 = pnand %p716_p10, %p145_p11  ;;  %p1088_p4 = pnand %p764_p1, %p74_p5 }
  0x1b   : > { %s35_s28 = sadd.s32 1, %s983_s16  ;;  %s719_s29 = sshll.u32 %s1084_s26, 4 }
  0x1c   : > { %p748_p0 = pneg %p1078_p13  ;;  %p37_p6 = scmp.ge.s32.totalorder %s35_s28, 2 }
  0x1d   : > { %s1427_s0 = sld [smem:[#allocation16_spill]] }
  0x1e   : > { %p749_p2 = pnand %p748_p0, %p1057_p3 }
  0x20   : > { %p826_p11 = pneg %p749_p2 }
  0x23   : > { %s824_s5 = scalar_lea.hbm %s1427_s0, 32 }
  0x24   : > { %p825_p10 = scmp.ne.s32.totalorder %s1427_s0, %s824_s5  ;;  %p831_p5 = scmp.lt.u32.totalorder %s824_s5, %s1427_s0 }
  0x26   : > { %p827_p12 = pnand %p826_p11, %p825_p10 }
  0x28   : > { %p828_p9 = pneg %p827_p12 }
  0x2a   : > { %p833_p1 = pnand %p831_p5, %p828_p9 }
  0x2c   : > { %836 = shalt.err (!%p833_p1)
}
  0x2d   : > { %s989_s10 = smov [#allocation2]   ;;  %s1443_s28 = smov (%p37_p6, %s35_s28), 0 }
  0x2e   : > { %751 = dma.hbm_to_smem (!%p749_p2), %s1427_s0, 32, %s989_s10, [#allocation5]  }
  0x2f   : > { %1428 = sst [smem:[#allocation15_spill]] %s1443_s28  ;;  %s720_s19 = sshll.u32 %s983_s16, 7 }
  0x30   : > { %s60_s30 = ssub.s32 %s983_s16, %s1443_s28  ;;  %s1429_s1 = sld [smem:[#allocation17_spill]] }
  0x31   : > { %p63_p9 = scmp.eq.s32.totalorder %s60_s30, 0  ;;  %s171_s7 = scalar_lea.vmem [#allocation6], %s719_s29 }
  0x32   : > { %s178_s8 = sshll.u32 %s171_s7, 4  ;;  %s168_s10 = scalar_lea.sflag [#allocation3], %s1084_s26  ;;  %s1120_s8 = int_to_ptr.vmem [resolvable:$true] %s178_s8 }
  0x33   : > { %s1125_s9 = scalar_select %p63_p9, %s975_s14, %s65_s20  }
  0x34   : > { %p839_p0 = pneg %p1088_p4 }
  0x36   : > { %s1118_s6 = scalar_lea.hbm %s1429_s1, %s720_s19  ;;  %s842_s30 = scalar_lea.hbm %s1429_s1, 512 }
  0x37   : > { %s837_s11 = scalar_lea.hbm %s1118_s6, 256  ;;  %p843_p10 = scmp.lt.u32.totalorder %s1118_s6, %s1429_s1 }
  0x38   : > { %p838_p12 = scmp.ne.s32.totalorder %s1118_s6, %s837_s11  ;;  %p844_p11 = scmp.lt.u32.totalorder %s842_s30, %s837_s11 }
  0x39   : > { %p846_p1 = scmp.lt.u32.totalorder %s837_s11, %s1118_s6 }
  0x3a   : > { %p840_p2 = pnand %p839_p0, %p838_p12  ;;  %p845_p5 = por %p844_p11, %p843_p10 }
  0x3c   : > { %p841_p6 = pneg %p840_p2  ;;  %p847_p9 = por %p846_p1, %p845_p5 }
  0x3e   : > { %p848_p8 = pnand %p847_p9, %p841_p6 }
  0x40   : > { %851 = shalt.err (!%p848_p8)
}
  0x41   : > { %s852_s20 = scalar_lea.vmem %s1120_s8, 256  ;;  %s990_s7 = smov [#allocation6]  }
  0x42   : > { %p853_p12 = scmp.ne.s32.totalorder %s1120_s8, %s852_s20  ;;  %s857_s18 = sshll.u32 %s990_s7, 4  ;;  %s858_s18 = int_to_ptr.vmem [resolvable:$false] %s857_s18 }
  0x43   : > { %s859_s4 = scalar_lea.vmem %s858_s18, 512  ;;  %p860_p3 = scmp.lt.s32.totalorder %s1120_s8, %s858_s18 }
  0x44   : > { %p855_p2 = pnand %p853_p12, %p839_p0  ;;  %p861_p10 = scmp.lt.s32.totalorder %s859_s4, %s852_s20 }
  0x46   : > { %p856_p7 = pneg %p855_p2  ;;  %p862_p11 = por %p861_p10, %p860_p3 }
  0x48   : > { %p863_p5 = pnand %p862_p11, %p856_p7 }
  0x4a   : > { %866 = shalt.err (!%p863_p5)
}
  0x4b   : > { %s991_s11 = smov 256   ;;  %s992_s30 = smov 128  }
  0x4c   : > { %s993_s29 = smov 8   ;;  %s721_s5 = sshll.u32 %s1084_s26, 5 }
  0x4d   : > { %755 = dma.hbm_to_vmem [thread:$0]  (!%p1088_p4), %s1118_s6, 256, %s1120_s8, %s168_s10, %s991_s11, %s992_s30, %s993_s29  }
  0x4e   : > { %s1430_s2 = sld [smem:[#allocation18_spill]]  ;;  %s192_s4 = scalar_lea.vmem [#allocation7], %s721_s5 }
  0x4f   : > { %s199_s0 = sshll.u32 %s192_s4, 4  ;;  %s189_s1 = scalar_lea.sflag [#allocation8], %s1084_s26  ;;  %s1166_s0 = int_to_ptr.vmem [resolvable:$true] %s199_s0 }
  0x54   : > { %s1164_s18 = scalar_lea.hbm %s1430_s2, %s720_s19  ;;  %s872_s19 = scalar_lea.hbm %s1430_s2, 1024 }
  0x55   : > { %s867_s28 = scalar_lea.hbm %s1164_s18, 512  ;;  %p873_p6 = scmp.lt.u32.totalorder %s1164_s18, %s1430_s2 }
  0x56   : > { %p868_p3 = scmp.ne.s32.totalorder %s1164_s18, %s867_s28  ;;  %p874_p1 = scmp.lt.u32.totalorder %s872_s19, %s867_s28 }
  0x57   : > { %p876_p12 = scmp.lt.u32.totalorder %s867_s28, %s1164_s18 }
  0x58   : > { %p870_p7 = pnand %p868_p3, %p839_p0  ;;  %p875_p9 = por %p874_p1, %p873_p6 }
  0x5a   : > { %p871_p8 = pneg %p870_p7  ;;  %p877_p2 = por %p876_p12, %p875_p9 }
  0x5c   : > { %p878_p10 = pnand %p877_p2, %p871_p8 }
  0x5e   : > { %881 = shalt.err (!%p878_p10)
}
  0x5f   : > { %s882_s5 = scalar_lea.vmem %s1166_s0, 512  ;;  %s994_s7 = smov [#allocation7]  }
  0x60   : > { %p883_p11 = scmp.ne.s32.totalorder %s1166_s0, %s882_s5  ;;  %s887_s4 = sshll.u32 %s994_s7, 4  ;;  %s888_s4 = int_to_ptr.vmem [resolvable:$false] %s887_s4 }
  0x61   : > { %s889_s6 = scalar_lea.vmem %s888_s4, 1024  ;;  %p890_p7 = scmp.lt.s32.totalorder %s1166_s0, %s888_s4 }
  0x62   : > { %p885_p5 = pnand %p883_p11, %p839_p0  ;;  %p891_p6 = scmp.lt.s32.totalorder %s889_s6, %s882_s5 }
  0x64   : > { %p886_p3 = pneg %p885_p5  ;;  %p892_p1 = por %p891_p6, %p890_p7 }
  0x66   : > { %p893_p9 = pnand %p892_p1, %p886_p3 }
  0x68   : > { %896 = shalt.err (!%p893_p9)
}
  0x69   : > { %758 = dma.hbm_to_vmem [thread:$0]  (!%p1088_p4), %s1164_s18, 512, %s1166_s0, %s189_s1, %s991_s11, %s992_s30, %s993_s29  }
  0x6a   : > { %211 = sbr.rel (%p1078_p13) target bundleno = 258 (0x102), region = 32  ;;  %p1431_p0 = scmp.ne.s32.totalorder (!%p1078_p13), %s1421_s21, 0 }
  0x71   : > { %950 = dma.done.wait (%p1431_p0), [#allocation5], 32  }
  0x72   : > { %952 = vsyncadd (%p1431_p0), [#allocation5], 4294967264  ;;  %s1204_s27 = sand.u32 1, %s971_s13   ;;  %p1432_p4 = scmp.ne.s32.totalorder %s1422_s22, 0 }
  0x73   : > { %s1415_s26 = sshll.u32 %s1204_s27, 4  ;;  %s218_s28 = scalar_lea.sflag [#allocation3], %s1204_s27 }
  0x74   : > { %s1210_s0 = scalar_lea.vmem [#allocation6], %s1415_s26 }
  0x75   : > { %954 = dma.done.wait (%p1432_p4), %s218_s28, 256  }
  0x76   : > { %956 = vsyncadd (%p1432_p4), %s218_s28, 4294967040  ;;  %s726_s1 = sshll.u32 %s1204_s27, 5  ;;  %s227_s21 = scalar_lea.sflag [#allocation8], %s1204_s27 }
  0x77   : > { %s230_s25 = scalar_lea.vmem [#allocation7], %s726_s1 }
  0x78   : > { %958 = dma.done.wait (%p1432_p4), %s227_s21, 512  }
  0x79   : > { %960 = vsyncadd (%p1432_p4), %s227_s21, 4294966784 }
  0x7a   : > { %235 = sfence }
  0x7b   : > { %s1223_s11 = sshll.u32 %s979_s15, 7  ;;  %v311_v0 = vld [vmem:[%s230_s25] sm:$0xff]  ;;  %v730_v1 = vld [vmem:[%s230_s25 + $0x8] sm:$0xff]  ;;  %v731_v2 = vld [vmem:[%s230_s25 + $0x10] sm:$0xff]  ;;  %p1434_p8 = scmp.ne.s32.totalorder %s1423_s23, 0 }
  0x7c   : > { %s1226_s30 = sld [smem:[#allocation2 + %s1223_s11]]  ;;  %s261_s29 = sadd.s32 1, %s1223_s11  ;;  %v732_v3 = vld [vmem:[%s230_s25 + $0x18] sm:$0xff]  ;;  %v312_v4 = vmax.f32 %v311_v0, 0.0  ;;  %v1258_v5 = vld [vmem:[%s1210_s0] sm:$0xff]  ;;  %v329_v6 = vmax.f32 %v730_v1, 0.0 }
  0x7d   : > { %s1229_s18 = sld [smem:[#allocation2 + %s261_s29]]  ;;  %s263_s22 = sadd.s32 2, %s1223_s11  ;;  %v345_v7 = vmax.f32 %v731_v2, 0.0  ;;  %v361_v8 = vmax.f32 %v732_v3, 0.0  ;;  %v306_v9 = vand.u32 2147483647, %v1258_v5 }
  0x7e   : > { %s1232_s8 = sld [smem:[#allocation2 + %s263_s22]]  ;;  %s265_s15 = sadd.s32 3, %s1223_s11  ;;  %v313_v10 = vmin.f32 %v312_v4, 1.0  ;;  %v330_v13 = vmin.f32 %v329_v6, 1.0 }
  0x7f   : > { %s1235_s19 = sld [smem:[#allocation2 + %s265_s15]]  ;;  %s267_s10 = sadd.s32 4, %s1223_s11  ;;  %v346_v14 = vmin.f32 %v345_v7, 1.0  ;;  %v362_v18 = vmin.f32 %v361_v8, 1.0 }
  0x80   : > { %s1238_s20 = sld [smem:[#allocation2 + %s267_s10]]  ;;  %s269_s5 = sadd.s32 5, %s1223_s11 }
  0x81   : > { %s1241_s7 = sld [smem:[#allocation2 + %s269_s5]]  ;;  %s271_s4 = sadd.s32 6, %s1223_s11 }
  0x82   : > { %s1244_s6 = sld [smem:[#allocation2 + %s271_s4]]  ;;  %s273_s28 = sadd.s32 7, %s1223_s11  ;;  %v314_v19 = vstv %s1226_s30 }
  0x83   : > { %s1247_s1 = sld [smem:[#allocation2 + %s273_s28]]  ;;  %s275_s21 = sadd.s32 8, %s1223_s11  ;;  %v331_v28 = vstv %s1229_s18  ;;  %v315_v31 = vmul.f32 %v314_v19, %v313_v10 }
  0x84   : > { %s276_s29 = sld [smem:[#allocation2 + %s275_s21]]  ;;  %s277_s22 = sadd.s32 9, %s1223_s11  ;;  %v347_v36 = vstv %s1232_s8  ;;  %v332_v40 = vmul.f32 %v331_v28, %v330_v13 }
  0x85   : > { %s1251_s15 = sld [smem:[#allocation2 + %s277_s22]]  ;;  %s279_s10 = sadd.s32 10, %s1223_s11  ;;  %v363_v45 = vstv %s1235_s19  ;;  %v348_v49 = vmul.f32 %v347_v36, %v346_v14 }
  0x86   : > { %s1254_s5 = sld [smem:[#allocation2 + %s279_s10]]  ;;  %s281_s4 = sadd.s32 11, %s1223_s11  ;;  %v320_v12 = vstv %s1238_s20  ;;  %v364_v58 = vmul.f32 %v363_v45, %v362_v18 }
  0x87   : > { %s1260_s28 = sld [smem:[#allocation2 + %s281_s4]]  ;;  %s283_s21 = sadd.s32 12, %s1223_s11  ;;  %v336_v17 = vstv %s1241_s7 }
  0x88   : > { %s1263_s25 = sld [smem:[#allocation2 + %s283_s21]]  ;;  %s285_s22 = sadd.s32 13, %s1223_s11  ;;  %v352_v22 = vstv %s1244_s6 }
  0x89   : > { %s1266_s26 = sld [smem:[#allocation2 + %s285_s22]]  ;;  %s287_s10 = sadd.s32 14, %s1223_s11  ;;  %v368_v26 = vstv %s1247_s1 }
  0x8a   : > { %s1270_s2 = sld [smem:[#allocation2 + %s287_s10]]  ;;  %s289_s4 = sadd.s32 15, %s1223_s11  ;;  %v318_v11 = vstv %s276_s29 }
  0x8b   : > { %s1274_s21 = sld [smem:[#allocation2 + %s289_s4]]  ;;  %s291_s22 = sadd.s32 16, %s1223_s11  ;;  %v319_v15 = vmul.f32 %v318_v11, %v313_v10  ;;  %v334_v16 = vstv %s1251_s15 }
  0x8c   : > { %s1279_s10 = sld [smem:[#allocation2 + %s291_s22]]  ;;  %s293_s16 = sadd.s32 17, %s1223_s11  ;;  %v335_v20 = vmul.f32 %v334_v16, %v330_v13  ;;  %v350_v21 = vstv %s1254_s5 }
  0x8d   : > { %s1285_s20 = sld [smem:[#allocation2 + %s293_s16]]  ;;  %s295_s29 = sadd.s32 18, %s1223_s11  ;;  %v321_v23 = vadd.f32 %v320_v12, %v319_v15  ;;  %v351_v24 = vmul.f32 %v350_v21, %v346_v14  ;;  %v366_v25 = vstv %s1260_s28 }
  0x8e   : > { %s1290_s7 = sld [smem:[#allocation2 + %s295_s29]]  ;;  %s297_s15 = sadd.s32 19, %s1223_s11  ;;  %v322_v27 = vstv %s1263_s25  ;;  %v337_v29 = vadd.f32 %v336_v17, %v335_v20  ;;  %v367_v30 = vmul.f32 %v366_v25, %v362_v18 }
  0x8f   : > { %v323_v32 = vmul.f32 %v322_v27, %v306_v9  ;;  %v338_v33 = vstv %s1266_s26  ;;  %v353_v34 = vadd.f32 %v352_v22, %v351_v24  ;;  %s1296_s16 = sld [smem:[#allocation2 + %s297_s15]]  ;;  %s299_s18 = sadd.s32 20, %s1223_s11 }
  0x90   : > { %v339_v35 = vmul.f32 %v338_v33, %v306_v9  ;;  %v354_v37 = vstv %s1270_s2  ;;  %v369_v38 = vadd.f32 %v368_v26, %v367_v30  ;;  %s301_s2 = sadd.s32 21, %s1223_s11  ;;  %s300_s8 = sld [smem:[#allocation2 + %s299_s18]] }
  0x91   : > { %v324_v39 = vsub.f32 %v321_v23, %v323_v32  ;;  %v355_v41 = vmul.f32 %v354_v37, %v306_v9  ;;  %v370_v42 = vstv %s1274_s21  ;;  %s302_s30 = sld [smem:[#allocation2 + %s301_s2]]  ;;  %s1355_s28 = scalar_lea.hbm %s1409_s3, %s1223_s11 }
  0x92   : > { %v316_v43 = vstv %s1279_s10  ;;  %v340_v44 = vsub.f32 %v337_v29, %v339_v35  ;;  %v371_v46 = vmul.f32 %v370_v42, %v306_v9  ;;  %s582_s25 = scalar_lea.sflag [#allocation4], %s1204_s27  ;;  %s995_s21 = smov [#allocation9]  }
  0x93   : > { %v317_v47 = vadd.f32 %v316_v43, %v315_v31  ;;  %v325_v48 = vmul.f32 %v324_v39, %v313_v10  ;;  %v356_v50 = vsub.f32 %v353_v34, %v355_v41  ;;  %v309_v52 = vstv %s1285_s20  ;;  %s901_s22 = sshll.u32 %s995_s21, 4  ;;  %s902_s22 = int_to_ptr.vmem [resolvable:$false] %s901_s22 }
  0x94   : > { %v307_v51 = vstv %s1290_s7  ;;  %v341_v53 = vmul.f32 %v340_v44, %v330_v13  ;;  %v372_v54 = vsub.f32 %v369_v38, %v371_v46  ;;  %s903_s11 = scalar_lea.vmem %s902_s22, 512 }
  0x95   : > { %v308_v55 = vmul.f32 %v307_v51, %v306_v9  ;;  %v333_v56 = vadd.f32 %v332_v40, %v317_v47  ;;  %v357_v57 = vmul.f32 %v356_v50, %v346_v14  ;;  %v375_v62 = vstv %s1296_s16  ;;  %s391_s26 = smul.f32 0.0166667, %s1296_s16 }
  0x96   : > { %v373_v59 = vmul.f32 %v372_v54, %v362_v18  ;;  %v388_v16 = vstv %s300_s8 }
  0x97   : > { %v310_v60 = vsub.f32 %v309_v52, %v308_v55  ;;  %v349_v61 = vadd.f32 %v348_v49, %v333_v56  ;;  %v392_v4 = vstv %s391_s26  ;;  %v377_v8 = vstv %s302_s30 }
  0x99   : > { %v326_v63 = vadd.f32 %v325_v48, %v310_v60  ;;  %v365_v0 = vadd.f32 %v364_v58, %v349_v61 }
  0x9b   : > { %v342_v1 = vadd.f32 %v341_v53, %v326_v63  ;;  %v376_v2 = vmul.f32 %v375_v62, %v365_v0 }
  0x9d   : > { %v358_v3 = vadd.f32 %v357_v57, %v342_v1  ;;  %822 = vrsqrt.f32 %v376_v2  ;;  %v378_v10 = vadd.f32 %v377_v8, %v376_v2  ;;  %vm382_vm0 = vcmp.eq.f32.partialorder %v376_v2, inf }
  0x9e   : > { %v385_v11 = vand.u32 2147483648, %v376_v2  ;;  %vm384_vm1 = vcmp.eq.f32.partialorder %v376_v2, 0.0 }
  0x9f   : > { %v374_v6 = vadd.f32 %v373_v59, %v358_v3  ;;  %v379_v14 = vsub.f32 0.0, %v378_v10 }
  0xa1   : > { %v1309_v7 = vmul.f32 %v392_v4, %v374_v6  ;;  %v1311_v19 = vmul.f32 0.0020833374, %v379_v14 }
  0xa3   : > { %v396_v22 = vmul.f32 0.0010416687, %v1311_v19 }
  0xa5   : > { %v416_v26 = vmul.f32 0.0020833374, %v396_v22  ;;  %v403_v47 = vadd.f32 1.0, %v396_v22 }
  0xa7   : > { %v823_v9 = vpop.eup %822 }
  0xa8   : > { %v381_v12 = vmul.f32 %v823_v9, %v376_v2 }
  0xaa   : > { %v383_v13 = vsel %vm382_vm0, %v376_v2, %v381_v12 }
  0xab   : > { %v386_v15 = vsel %vm384_vm1, %v385_v11, %v383_v13 }
  0xac   : > { %v387_v17 = vmul.f32 2.0, %v386_v15 }
  0xae   : > { %v389_v18 = vadd.f32 %v388_v16, %v387_v17 }
  0xb0   : > { %v390_v20 = vsub.f32 0.0, %v389_v18 }
  0xb2   : > { %v1313_v21 = vmul.f32 0.0020833374, %v390_v20 }
  0xb4   : > { %v397_v23 = vmul.f32 0.0010416687, %v1313_v21  ;;  %v398_v24 = vmul.f32 %v1313_v21, %v1311_v19  ;;  %v400_v25 = vmul.f32 %v1313_v21, %v1313_v21  ;;  %v410_v39 = vmul.f32 0.5, %v1313_v21 }
  0xb5   : > { %v406_v48 = vadd.f32 1.0, %v1313_v21 }
  0xb6   : > { %v399_v27 = vmul.f32 0.5, %v398_v24  ;;  %v401_v28 = vmul.f32 0.5, %v400_v25  ;;  %v414_v29 = vmul.f32 %v397_v23, %v1311_v19  ;;  %v417_v30 = vmul.f32 %v397_v23, %v1313_v21 }
  0xb7   : > { %v408_v44 = vmul.f32 0.33333334, %v397_v23  ;;  %v411_v51 = vadd.f32 1.0, %v410_v39  ;;  %v404_v55 = vadd.f32 0.0020833374, %v397_v23 }
  0xb8   : > { %v402_v31 = vadd.f32 %v401_v28, %v396_v22  ;;  %v422_v32 = vmul.f32 0.0020833374, %v399_v27  ;;  %v415_v33 = vmul.f32 0.33333334, %v414_v29  ;;  %v418_v34 = vadd.f32 %v417_v30, %v416_v26 }
  0xb9   : > { %v405_v56 = vadd.f32 %v399_v27, %v1311_v19  ;;  %v409_v59 = vadd.f32 0.0010416687, %v408_v44 }
  0xba   : > { %v420_v35 = vmul.f32 %v402_v31, %v1311_v19  ;;  %v423_v36 = vmul.f32 %v402_v31, %v1313_v21  ;;  %v419_v37 = vmul.f32 0.33333334, %v418_v34  ;;  %v436_v38 = vmul.f32 0.0020833374, %v415_v33 }
  0xbb   : > { %v412_v52 = vmul.f32 0.33333334, %v402_v31  ;;  %v407_v63 = vadd.f32 %v406_v48, %v402_v31  ;;  %v426_v0 = vadd.f32 %v415_v33, %v403_v47 }
  0xbc   : > { %v421_v40 = vmul.f32 0.33333334, %v420_v35  ;;  %v424_v41 = vadd.f32 %v423_v36, %v422_v32  ;;  %v434_v42 = vmul.f32 %v419_v37, %v1311_v19  ;;  %v437_v43 = vmul.f32 %v419_v37, %v1313_v21 }
  0xbd   : > { %v430_v60 = vmul.f32 0.25, %v419_v37  ;;  %v413_v3 = vadd.f32 %v412_v52, %v411_v51  ;;  %v427_v9 = vadd.f32 %v419_v37, %v404_v55 }
  0xbe   : > { %v425_v45 = vmul.f32 0.33333334, %v424_v41  ;;  %v442_v46 = vmul.f32 0.0020833374, %v421_v40  ;;  %v435_v49 = vmul.f32 0.25, %v434_v42  ;;  %v438_v50 = vadd.f32 %v437_v43, %v436_v38 }
  0xbf   : > { %v428_v10 = vadd.f32 %v421_v40, %v405_v56  ;;  %v431_v13 = vadd.f32 %v430_v60, %v409_v59 }
  0xc0   : > { %v440_v53 = vmul.f32 %v425_v45, %v1311_v19  ;;  %v443_v54 = vmul.f32 %v425_v45, %v1313_v21  ;;  %v439_v57 = vmul.f32 0.25, %v438_v50  ;;  %v456_v58 = vmul.f32 0.0020833374, %v435_v49 }
  0xc1   : > { %v432_v4 = vmul.f32 0.25, %v425_v45  ;;  %v429_v17 = vadd.f32 %v425_v45, %v407_v63  ;;  %v446_v18 = vadd.f32 %v435_v49, %v426_v0 }
  0xc2   : > { %v441_v61 = vmul.f32 0.25, %v440_v53  ;;  %v444_v62 = vadd.f32 %v443_v54, %v442_v46  ;;  %v454_v1 = vmul.f32 %v439_v57, %v1311_v19  ;;  %v457_v2 = vmul.f32 %v439_v57, %v1313_v21 }
  0xc3   : > { %v450_v14 = vmul.f32 0.2, %v439_v57  ;;  %v433_v23 = vadd.f32 %v432_v4, %v413_v3  ;;  %v447_v27 = vadd.f32 %v439_v57, %v427_v9 }
  0xc4   : > { %v445_v6 = vmul.f32 0.25, %v444_v62  ;;  %v462_v8 = vmul.f32 0.0020833374, %v441_v61  ;;  %v455_v11 = vmul.f32 0.2, %v454_v1  ;;  %v458_v12 = vadd.f32 %v457_v2, %v456_v58 }
  0xc5   : > { %v448_v28 = vadd.f32 %v441_v61, %v428_v10  ;;  %v451_v31 = vadd.f32 %v450_v14, %v431_v13 }
  0xc6   : > { %v460_v15 = vmul.f32 %v445_v6, %v1311_v19  ;;  %v463_v16 = vmul.f32 %v445_v6, %v1313_v21  ;;  %v459_v20 = vmul.f32 0.2, %v458_v12  ;;  %v476_v22 = vmul.f32 0.0020833374, %v455_v11 }
  0xc7   : > { %v452_v24 = vmul.f32 0.2, %v445_v6  ;;  %v466_v35 = vadd.f32 %v455_v11, %v446_v18  ;;  %v449_v38 = vadd.f32 %v445_v6, %v429_v17 }
  0xc8   : > { %v461_v25 = vmul.f32 0.2, %v460_v15  ;;  %v464_v26 = vadd.f32 %v463_v16, %v462_v8  ;;  %v474_v29 = vmul.f32 %v459_v20, %v1311_v19  ;;  %v477_v30 = vmul.f32 %v459_v20, %v1313_v21 }
  0xc9   : > { %v470_v33 = vmul.f32 0.16666667, %v459_v20  ;;  %v453_v39 = vadd.f32 %v452_v24, %v433_v23  ;;  %v467_v42 = vadd.f32 %v459_v20, %v447_v27 }
  0xca   : > { %v465_v32 = vmul.f32 0.2, %v464_v26  ;;  %v482_v34 = vmul.f32 0.0020833374, %v461_v25  ;;  %v475_v36 = vmul.f32 0.16666667, %v474_v29  ;;  %v478_v37 = vadd.f32 %v477_v30, %v476_v22 }
  0xcb   : > { %v468_v46 = vadd.f32 %v461_v25, %v448_v28  ;;  %v471_v47 = vadd.f32 %v470_v33, %v451_v31 }
  0xcc   : > { %v480_v40 = vmul.f32 %v465_v32, %v1311_v19  ;;  %v483_v41 = vmul.f32 %v465_v32, %v1313_v21  ;;  %v472_v43 = vmul.f32 0.16666667, %v465_v32  ;;  %v479_v44 = vmul.f32 0.16666667, %v478_v37 }
  0xcd   : > { %v496_v45 = vmul.f32 0.0020833374, %v475_v36  ;;  %v486_v50 = vadd.f32 %v475_v36, %v466_v35  ;;  %v469_v54 = vadd.f32 %v465_v32, %v449_v38 }
  0xce   : > { %v481_v48 = vmul.f32 0.16666667, %v480_v40  ;;  %v484_v49 = vadd.f32 %v483_v41, %v482_v34  ;;  %v490_v51 = vmul.f32 0.14285715, %v479_v44  ;;  %v494_v52 = vmul.f32 %v479_v44, %v1311_v19 }
  0xcf   : > { %v497_v53 = vmul.f32 %v479_v44, %v1313_v21  ;;  %v473_v57 = vadd.f32 %v472_v43, %v453_v39  ;;  %v487_v58 = vadd.f32 %v479_v44, %v467_v42 }
  0xd0   : > { %v485_v55 = vmul.f32 0.16666667, %v484_v49  ;;  %v502_v56 = vmul.f32 0.0020833374, %v481_v48  ;;  %v495_v59 = vmul.f32 0.14285715, %v494_v52  ;;  %v488_v61 = vadd.f32 %v481_v48, %v468_v46 }
  0xd1   : > { %v498_v60 = vadd.f32 %v497_v53, %v496_v45  ;;  %v491_v1 = vadd.f32 %v490_v51, %v471_v47 }
  0xd2   : > { %v492_v62 = vmul.f32 0.14285715, %v485_v55  ;;  %v500_v63 = vmul.f32 %v485_v55, %v1311_v19  ;;  %v503_v0 = vmul.f32 %v485_v55, %v1313_v21  ;;  %v506_v3 = vadd.f32 %v495_v59, %v486_v50 }
  0xd3   : > { %v499_v2 = vmul.f32 0.14285715, %v498_v60  ;;  %v489_v4 = vadd.f32 %v485_v55, %v469_v54  ;;  %v729_v54 = vld [vmem:[%s1210_s0 + $0x8] sm:$0xff]  ;;  %s1433_s0 = sshll.u32 %s1204_s27, 4 }
  0xd4   : > { %v501_v6 = vmul.f32 0.14285715, %v500_v63  ;;  %v504_v8 = vadd.f32 %v503_v0, %v502_v56  ;;  %v514_v11 = vadd.f32 1.0, %v506_v3  ;;  %v493_v12 = vadd.f32 %v492_v62, %v473_v57  ;;  %s258_s19 = scalar_lea.vmem [#allocation9], %s1433_s0 }
  0xd5   : > { %v507_v9 = vadd.f32 %v499_v2, %v487_v58  ;;  %v510_v10 = vmul.f32 0.125, %v499_v2  ;;  %v526_v15 = vmul.f32 %v506_v3, %v506_v3  ;;  %s595_s6 = sshll.u32 %s258_s19, 4  ;;  %s1357_s6 = int_to_ptr.vmem [resolvable:$true] %s595_s6 }
  0xd6   : > { %v505_v13 = vmul.f32 0.14285715, %v504_v8  ;;  %v508_v14 = vadd.f32 %v501_v6, %v488_v61  ;;  %s897_s4 = scalar_lea.vmem %s1357_s6, 256  ;;  %p904_p10 = scmp.lt.s32.totalorder %s1357_s6, %s902_s22 }
  0xd7   : > { %v511_v16 = vadd.f32 %v510_v10, %v491_v1  ;;  %p898_p13 = scmp.ne.s32.totalorder %s1357_s6, %s897_s4  ;;  %p905_p11 = scmp.lt.s32.totalorder %s903_s11, %s897_s4 }
  0xd8   : > { %v509_v17 = vadd.f32 %v505_v13, %v489_v4  ;;  %v512_v18 = vmul.f32 0.125, %v505_v13  ;;  %v525_v20 = vmul.f32 %v508_v14, %v507_v9 }
  0xd9   : > { %v515_v19 = vmul.f32 %v514_v11, %v511_v16  ;;  %v519_v22 = vmul.f32 %v511_v16, %v508_v14  ;;  %p899_p12 = pnand %p898_p13, %p1434_p8  ;;  %p906_p5 = por %p905_p11, %p904_p10 }
  0xda   : > { %v513_v21 = vadd.f32 %v512_v18, %v493_v12  ;;  %v520_v23 = vadd.f32 1.0, %v509_v17  ;;  %v524_v24 = vadd.f32 %v509_v17, %v506_v3  ;;  %v527_v25 = vadd.f32 %v526_v15, %v525_v20 }
  0xdb   : > { %v528_v26 = vmul.f32 %v509_v17, %v509_v17  ;;  %p900_p2 = pneg %p899_p12 }
  0xdc   : > { %v516_v27 = vmul.f32 %v513_v21, %v507_v9  ;;  %v521_v28 = vmul.f32 %v520_v23, %v513_v21  ;;  %v530_v29 = vmul.f32 %v524_v24, %v507_v9  ;;  %v531_v30 = vmul.f32 %v524_v24, %v508_v14 }
  0xdd   : > { %v529_v31 = vadd.f32 %v528_v26, %v525_v20  ;;  %v544_v32 = vmul.f32 %v527_v25, %v527_v25  ;;  %v532_v35 = vadd.f32 1.0, %v527_v25  ;;  %p907_p3 = pnand %p906_p5, %p900_p2 }
  0xde   : > { %v517_v33 = vadd.f32 %v516_v27, %v515_v19  ;;  %v522_v34 = vadd.f32 %v521_v28, %v519_v22  ;;  %v543_v36 = vmul.f32 %v531_v30, %v530_v29 }
  0xdf   : > { %v538_v37 = vadd.f32 1.0, %v529_v31  ;;  %v542_v38 = vadd.f32 %v529_v31, %v527_v25  ;;  %v546_v39 = vmul.f32 %v529_v31, %v529_v31 }
  0xe0   : > { %v518_v40 = vmul.f32 0.5, %v517_v33  ;;  %v523_v41 = vmul.f32 0.5, %v522_v34  ;;  %v545_v42 = vadd.f32 %v544_v32, %v543_v36 }
  0xe1   : > { %v547_v43 = vadd.f32 %v546_v39, %v543_v36  ;;  %v548_v44 = vmul.f32 %v542_v38, %v530_v29  ;;  %v549_v45 = vmul.f32 %v542_v38, %v531_v30 }
  0xe2   : > { %v533_v46 = vmul.f32 %v532_v35, %v518_v40  ;;  %v534_v47 = vmul.f32 %v530_v29, %v523_v41  ;;  %v537_v48 = vmul.f32 %v531_v30, %v518_v40  ;;  %v539_v49 = vmul.f32 %v538_v37, %v523_v41 }
  0xe3   : > { %v550_v50 = vadd.f32 1.0, %v545_v42  ;;  %v556_v51 = vadd.f32 1.0, %v547_v43  ;;  %v560_v52 = vadd.f32 %v547_v43, %v545_v42  ;;  %v561_v53 = vmul.f32 %v549_v45, %v548_v44 }
  0xe4   : > { %v535_v55 = vadd.f32 %v534_v47, %v533_v46  ;;  %v540_v56 = vadd.f32 %v539_v49, %v537_v48  ;;  %v562_v57 = vmul.f32 %v545_v42, %v545_v42  ;;  %v564_v58 = vmul.f32 %v547_v43, %v547_v43 }
  0xe5   : > { %v566_v59 = vmul.f32 %v560_v52, %v548_v44  ;;  %v567_v60 = vmul.f32 %v560_v52, %v549_v45 }
  0xe6   : > { %v536_v61 = vmul.f32 0.5, %v535_v55  ;;  %v541_v62 = vmul.f32 0.5, %v540_v56  ;;  %v563_v63 = vadd.f32 %v562_v57, %v561_v53  ;;  %v565_v0 = vadd.f32 %v564_v58, %v561_v53 }
  0xe7   : > { %v569_v1 = vmul.f32 %v729_v54, %v566_v59  ;;  %v573_v2 = vmul.f32 %v567_v60, %v1258_v5 }
  0xe8   : > { %v551_v3 = vmul.f32 %v550_v50, %v536_v61  ;;  %v552_v4 = vmul.f32 %v548_v44, %v541_v62  ;;  %v555_v6 = vmul.f32 %v549_v45, %v536_v61  ;;  %v557_v8 = vmul.f32 %v556_v51, %v541_v62 }
  0xe9   : > { %v568_v9 = vmul.f32 %v563_v63, %v1258_v5  ;;  %v574_v10 = vmul.f32 %v729_v54, %v565_v0 }
  0xea   : > { %v553_v11 = vadd.f32 %v552_v4, %v551_v3  ;;  %v558_v12 = vadd.f32 %v557_v8, %v555_v6 }
  0xeb   : > { %v570_v15 = vadd.f32 %v569_v1, %v568_v9  ;;  %v575_v16 = vadd.f32 %v574_v10, %v573_v2 }
  0xec   : > { %v554_v13 = vmul.f32 0.5, %v553_v11  ;;  %v559_v14 = vmul.f32 0.5, %v558_v12 }
  0xee   : > { %v571_v17 = vmul.f32 %v554_v13, %v1309_v7  ;;  %v576_v18 = vmul.f32 %v559_v14, %v1309_v7 }
  0xf0   : > { %v572_v5 = vadd.f32 %v571_v17, %v570_v15  ;;  %v577_v20 = vadd.f32 %v576_v18, %v575_v16 }
  0xf2   : > { %578 = vst [vmem:[%s258_s19] sm:$0xff] %v572_v5  ;;  %733 = vst [vmem:[%s258_s19 + $0x8] sm:$0xff] %v577_v20 }
  0xf3   : > { %910 = shalt.err (!%p907_p3)
}
  0xf4   : > { %s911_s10 = scalar_lea.hbm %s1355_s28, 256  ;;  %s915_s7 = scalar_lea.hbm %s1409_s3, 512 }
  0xf5   : > { %p912_p7 = scmp.ne.s32.totalorder %s1355_s28, %s911_s10  ;;  %p916_p9 = scmp.lt.u32.totalorder %s1355_s28, %s1409_s3 }
  0xf6   : > { %p917_p0 = scmp.lt.u32.totalorder %s915_s7, %s911_s10  ;;  %p919_p13 = scmp.lt.u32.totalorder %s911_s10, %s1355_s28 }
  0xf7   : > { %p913_p6 = pnand %p912_p7, %p1434_p8 }
  0xf8   : > { %p918_p4 = por %p917_p0, %p916_p9 }
  0xf9   : > { %p914_p1 = pneg %p913_p6 }
  0xfa   : > { %p920_p12 = por %p919_p13, %p918_p4 }
  0xfc   : > { %p921_p2 = pnand %p920_p12, %p914_p1 }
  0xfe   : > { %924 = shalt.err (!%p921_p2)
}
  0xff   : > { %s996_s2 = smov 128   ;;  %s997_s26 = smov 256  }
 0x100   : > { %s998_s30 = smov 8  }
 0x101   : > { %746 = dma.vmem_to_hbm [thread:$0]  (%p1434_p8), %s1357_s6, 256, %s1355_s28, %s582_s25, %s996_s2, %s997_s26, %s998_s30  }
 0x102 PF: > { %s610_s18 = sand.u32 1, %s967_s12   ;;  %p1435_p10 = scmp.ne.s32.totalorder %s1424_s24, 0 }
 0x103   : > { %p1436_p11 = scmp.ge.s32.totalorder %s987_s17, 2  ;;  %s611_s8 = scalar_lea.sflag [#allocation4], %s610_s18 }
 0x105   : > { %p760_p5 = pnand %p1436_p11, %p1435_p10 }
 0x107   : > { %962 = dma.done.wait (!%p760_p5), %s611_s8, 256  }
 0x108   : > { %964 = vsyncadd (!%p760_p5), %s611_s8, 4294967040  ;;  %s23_s17 = sadd.s32 1, %s987_s17   ;;  %s1437_s15 = sld [smem:[#allocation14_spill]] }
 0x109   : > { %p20_p3 = scmp.ge.s32.totalorder %s23_s17, 4   ;;  %s1438_s16 = sld [smem:[#allocation15_spill]] }
 0x10a   : > { %s1439_s12 = smov %s971_s13  ;;  %s1440_s13 = smov %s975_s14 }
 0x10b   : > { %s1441_s14 = smov %s1125_s9  ;;  %22 = sbr.rel (!%p20_p3) target bundleno = 13 (0xd), region = 100 }
 0x112   :  { %616 = vsyncpa [#allocation3], 1 }
 0x113   :  { %618 = vsyncpa [#allocation3 + $0x1], 1 }
 0x114   :  { %619 = vsyncpa [#allocation8], 1 }
 0x115   :  { %621 = vsyncpa [#allocation8 + $0x1], 1 }
 0x116   :  { %622 = vsyncpa [#allocation4], 1 }
 0x117   :  { %624 = vsyncpa [#allocation4 + $0x1], 1 }
 0x118   :  { %625 = vsyncpa [#allocation5], 1 }
 0x119   :  { %627 = vsyncpa [#allocation5 + $0x1], 1 }

</bundles_post_ra>
